<compile_context>
chip_gen: v7x
topology: tpu7x:2x2x1
jax: 0.10.0
libtpu: 0.0.40
codegen_flags: <defaults>
</compile_context>

<pallas_src>
import functools

import jax
import jax.numpy as jnp
from jax.experimental import pallas as pl
from jax.experimental.pallas import tpu as pltpu

BN_EPS = 1e-5        # torch.nn.BatchNorm1d default eps
NORM_EPS = 1e-12     # torch.nn.functional.normalize default eps

# Explicit scoped-VMEM budget; leaves headroom on v7x's 64 MiB physical VMEM.
_VMEM_LIMIT_BYTES = 48 * 1024 * 1024


def _round_up(x, m):
    return (x + m - 1) // m * m


def _pick_tk(din_pad):
    # K tile over the Din reduction of the first Linear.  512 columns of w1 is
    # ~512*mlp_pad*2B (bf16) per pipeline buffer (x2 for double buffering).
    # On v7x with very large mlp_dim, halve this.
    if din_pad > 512 and din_pad % 512 == 0:
        return 512
    return din_pad


def _per_view_bn(v, n_per_view):
    """BatchNorm1d training-mode normalization with PER-VIEW batch statistics.

    Rows [0, n) are view 1, rows [n, 2n) are view 2 (views are stacked so
    weights stream through the MXU once).  Single-pass variance
    (E[x^2] - mu^2), clamped at >= 0 to guard f32 cancellation.
    """
    rows = jax.lax.broadcasted_iota(jnp.int32, v.shape, 0)
    is_v0 = rows < n_per_view
    m0 = is_v0.astype(jnp.float32)
    m1 = 1.0 - m0
    inv_n = 1.0 / float(n_per_view)

    def stats(mask):
        mu = jnp.sum(v * mask, axis=0, keepdims=True) * inv_n
        ms = jnp.sum(v * v * mask, axis=0, keepdims=True) * inv_n
        var = jnp.maximum(ms - mu * mu, 0.0)
        return mu, var

    mu0, var0 = stats(m0)
    mu1, var1 = stats(m1)
    mu = jnp.where(is_v0, mu0, mu1)
    var = jnp.where(is_v0, var0, var1)
    return (v - mu) * jax.lax.rsqrt(var + BN_EPS)


# ----------------------------------------------------------------------------
# Kernel 1: fused Linear -> BN(affine) -> ReLU -> Linear [-> BN(no affine)]
#   grid = (Din_pad // TK,)  -- reduction over Din, "arbitrary"
#   scratch: f32 (2N, mlp_pad) accumulator resident in VMEM
# ----------------------------------------------------------------------------
def _fused_mlp_kernel(x_ref, w1_ref, g1_ref, b1_ref, w2_ref, o_ref, acc_ref,
                      *, n_per_view, last_bn):
    k = pl.program_id(0)

    @pl.when(k == 0)
    def _():
        acc_ref[...] = jnp.zeros_like(acc_ref)

    # bf16 MXU matmul, f32 accumulation.
    acc_ref[...] += jnp.dot(x_ref[...], w1_ref[...],
                            preferred_element_type=jnp.float32)

    @pl.when(k == pl.num_programs(0) - 1)
    def _():
        # Epilogue fused into the last K step: BN stats computed in the same
        # sweep as the reduction finalize (no extra HBM pass over h).
        h = _per_view_bn(acc_ref[...], n_per_view)                  # BN (batch stats)
        h = jnp.maximum(h * g1_ref[...] + b1_ref[...], 0.0)         # affine + ReLU
        out = jnp.dot(h.astype(jnp.bfloat16), w2_ref[...],
                      preferred_element_type=jnp.float32)           # second Linear
        if last_bn:                                                 # BN(affine=False)
            out = _per_view_bn(out, n_per_view)
        o_ref[...] = out


def fused_mlp(x, w1, g1, b1, w2, *, n_per_view, last_bn):
    m2, din_pad = x.shape            # m2 = 2N (both views stacked)
    mlp_pad = w1.shape[1]
    out_pad = w2.shape[1]
    tk = _pick_tk(din_pad)
    grid = (din_pad // tk,)
    kernel = functools.partial(_fused_mlp_kernel, n_per_view=n_per_view,
                               last_bn=last_bn)
    return pl.pallas_call(
        kernel,
        out_shape=jax.ShapeDtypeStruct((m2, out_pad), jnp.float32),
        grid=grid,
        in_specs=[
            pl.BlockSpec((m2, tk), lambda k: (0, k)),            # x: stream K tiles
            pl.BlockSpec((tk, mlp_pad), lambda k: (k, 0)),       # w1: stream K tiles
            pl.BlockSpec((1, mlp_pad), lambda k: (0, 0)),        # gamma (resident)
            pl.BlockSpec((1, mlp_pad), lambda k: (0, 0)),        # beta  (resident)
            pl.BlockSpec((mlp_pad, out_pad), lambda k: (0, 0)),  # w2    (resident)
        ],
        out_specs=pl.BlockSpec((m2, out_pad), lambda k: (0, 0)),
        scratch_shapes=[pltpu.VMEM((m2, mlp_pad), jnp.float32)],
        compiler_params=pltpu.CompilerParams(
            # The only grid axis is the Din reduction.  Full-batch BN couples all
            # rows of a view, so the batch stays one M block (no "parallel" axis).
            dimension_semantics=("arbitrary",),
            vmem_limit_bytes=_VMEM_LIMIT_BYTES,
        ),
    )(x, w1, g1, b1, w2)


# ----------------------------------------------------------------------------
# Kernel 2: fused MoCo contrastive loss for both view pairings:
#   CE(norm(q1)·norm(k2)^T / T, arange)*2T + CE(norm(q2)·norm(k1)^T / T, arange)*2T
# ----------------------------------------------------------------------------
def _moco_loss_kernel(q1_ref, q2_ref, k1_ref, k2_ref, o_ref, *, T, n):
    def normalize(x):
        # F.normalize: x / max(||x||, eps) == x * rsqrt(max(||x||^2, eps^2)) (EUP).
        ss = jnp.sum(x * x, axis=1, keepdims=True)
        return x * jax.lax.rsqrt(jnp.maximum(ss, NORM_EPS * NORM_EPS))

    q1 = normalize(q1_ref[...])
    q2 = normalize(q2_ref[...])
    k1 = normalize(k1_ref[...])
    k2 = normalize(k2_ref[...])

    def ce_arange(qn, kn):
        # einsum('nc,mc->nm') / T ; correct-class logit is the row-wise dot
        # <q_i, k_i> (no NxN iota/where diagonal extraction).
        logits = jax.lax.dot_general(qn, kn, (((1,), (1,)), ((), ())),
                                     preferred_element_type=jnp.float32) / T
        diag = jnp.sum(qn * kn, axis=1, keepdims=True) / T
        row_max = jnp.max(logits, axis=1, keepdims=True)
        lse = row_max + jnp.log(jnp.sum(jnp.exp(logits - row_max), axis=1,
                                        keepdims=True))
        return jnp.sum(lse - diag) * (2.0 * T / n)

    o_ref[0, 0] = ce_arange(q1, k2) + ce_arange(q2, k1)


def moco_loss(q1, q2, k1, k2, T):
    # TODO(synk): for very large per-device N, turn this into a streaming
    # (flash-style) LSE over k column tiles instead of materializing NxN logits.
    kernel = functools.partial(_moco_loss_kernel, T=float(T), n=q1.shape[0])
    out = pl.pallas_call(
        kernel,
        out_shape=jax.ShapeDtypeStruct((1, 1), jnp.float32),
        in_specs=[pl.BlockSpec(memory_space=pltpu.MemorySpace.VMEM)] * 4,
        out_specs=pl.BlockSpec(memory_space=pltpu.MemorySpace.SMEM),
        compiler_params=pltpu.CompilerParams(vmem_limit_bytes=_VMEM_LIMIT_BYTES),
    )(q1, q2, k1, k2)
    return out[0, 0]


# ----------------------------------------------------------------------------
# MoCo.forward glue (default flags: no simclr / VIC / cmae / mae_aug / distill)
# ----------------------------------------------------------------------------
def moco_forward(base_params, momentum_params, x1, x2, m, *, T=1.0):
    # _update_momentum_encoder: p_m = m*p_m + (1-m)*p_b  (EMA math in f32,
    # stored back in the parameter dtype).
    # TODO(synk): at scale, do this in-place via a Pallas kernel with
    # input_output_aliases to avoid a full HBM rewrite of the weights per step.
    def ema(pm, pb):
        upd = pm.astype(jnp.float32) * m + pb.astype(jnp.float32) * (1.0 - m)
        return upd.astype(pm.dtype)
    momentum_enc = jax.tree.map(ema, momentum_params["enc"], base_params["enc"])

    n = x1.shape[0]
    din = x1.reshape(n, -1).shape[1]
    din_pad = base_params["enc"]["w1"].shape[0]

    # Stack the two views so each weight set is DMA'd / matmul'd once; pad the
    # feature axis to the kernel's (128-multiple) tiling and cast to bf16.
    x = jnp.concatenate([x1.reshape(n, -1), x2.reshape(n, -1)], axis=0)
    x = jnp.pad(x, ((0, 0), (0, din_pad - din))).astype(jnp.bfloat16)

    def encoder(p, xb):      # base/momentum encoder + projector (last_bn=True)
        return fused_mlp(xb, p["w1"], p["g1"], p["b1"], p["w2"],
                         n_per_view=n, last_bn=True)

    def predictor(p, z):     # MoCo-v3 predictor (last_bn=False)
        return fused_mlp(z.astype(jnp.bfloat16), p["w1"], p["g1"], p["b1"],
                         p["w2"], n_per_view=n, last_bn=False)

    # momentum branch (torch.no_grad)
    k = jax.lax.stop_gradient(encoder(momentum_enc, x))             # (2N, dim_pad)
    # query branch
    q = predictor(base_params["pred"], encoder(base_params["enc"], x))

    q1, q2 = q[:n], q[n:]
    k1, k2 = k[:n], k[n:]
    # concat_all_gather is identity for world_size == 1; labels = arange(N).
    loss = moco_loss(q1, q2, k1, k2, T)
    return loss, {"enc": momentum_enc}


def init_params(key, din, dim, mlp_dim):
    # All feature dims are zero-padded to 128-lane multiples (Din to the K tile)
    # so every kernel operand / output is lane-dense; padded rows/cols are zero
    # (and gamma=1, beta=0) so the padded math contributes exactly zero.
    din_pad = _round_up(din, 512)
    dim_pad = _round_up(dim, 128)
    mlp_pad = _round_up(mlp_dim, 128)

    ks = jax.random.split(key, 4)

    def linear(k, d_in, d_in_pad, d_out, d_out_pad):
        w = 0.02 * jax.random.normal(k, (d_in, d_out), jnp.float32)
        w = jnp.pad(w, ((0, d_in_pad - d_in), (0, d_out_pad - d_out)))
        # bf16 HBM-side weights: halves weight DMA bytes and feeds the MXU's
        # bf16 path (v6e/v7x); accumulation stays f32 inside the kernel.
        return w.astype(jnp.bfloat16)

    enc = {
        "w1": linear(ks[0], din, din_pad, mlp_dim, mlp_pad),
        "g1": jnp.ones((1, mlp_pad), jnp.float32),
        "b1": jnp.zeros((1, mlp_pad), jnp.float32),
        "w2": linear(ks[1], mlp_dim, mlp_pad, dim, dim_pad),
    }
    pred = {
        "w1": linear(ks[2], dim, dim_pad, mlp_dim, mlp_pad),
        "g1": jnp.ones((1, mlp_pad), jnp.float32),
        "b1": jnp.zeros((1, mlp_pad), jnp.float32),
        "w2": linear(ks[3], mlp_dim, mlp_pad, dim, dim_pad),
    }
    base = {"enc": enc, "pred": pred}
    # momentum encoder initialized as a copy of the base encoder (param_m.copy_)
    momentum = {"enc": jax.tree.map(lambda a: a, enc)}
    return base, momentum


if __name__ == "__main__":
    key = jax.random.PRNGKey(0)
    N, C, H, W = 2, 4, 16, 16
    DIM, MLP_DIM = 32, 64
    DIN = C * H * W

    k_params, k_x1, k_x2 = jax.random.split(key, 3)
    base_params, momentum_params = init_params(k_params, DIN, DIM, MLP_DIM)
    x1 = jax.random.normal(k_x1, (N, C, H, W), jnp.float32)
    x2 = jax.random.normal(k_x2, (N, C, H, W), jnp.float32)
    m = jnp.float32(0.99)  # moco momentum

    fwd = jax.jit(functools.partial(moco_forward, T=1.0))
    loss, new_momentum = fwd(base_params, momentum_params, x1, x2, m)
    loss = jax.block_until_ready(loss)
    jax.block_until_ready(new_momentum)
    assert loss.shape == () and bool(jnp.isfinite(loss))
    print("KERNEL_OK")
</pallas_src>

<mosaic_0001>
module attributes {stable_mosaic.version = 11 : i64} {
  func.func @_fused_mlp_kernel(%arg0: i32, %arg1: memref<4x512xbf16, #tpu.memory_space<vmem>>, %arg2: memref<512x128xbf16, #tpu.memory_space<vmem>>, %arg3: memref<1x128xf32, #tpu.memory_space<vmem>>, %arg4: memref<1x128xf32, #tpu.memory_space<vmem>>, %arg5: memref<128x128xbf16, #tpu.memory_space<vmem>>, %arg6: memref<4x128xf32, #tpu.memory_space<vmem>>, %arg7: memref<4x128xf32, #tpu.memory_space<vmem>>) attributes {dimension_semantics = [#tpu.dimension_semantics<arbitrary>], iteration_bounds = array<i64: 2>, scalar_prefetch = 0 : i64, scratch_operands = 1 : i64, tpu.core_type = #tpu.core_type<tc>, window_params = [{transform_indices = @transform_0, window_bounds = array<i64: 4, 512>}, {transform_indices = @transform_1, window_bounds = array<i64: 512, 128>}, {pipeline_mode = #tpu.pipeline_mode<synchronous>, transform_indices = @transform_2, window_bounds = array<i64: 1, 128>}, {pipeline_mode = #tpu.pipeline_mode<synchronous>, transform_indices = @transform_3, window_bounds = array<i64: 1, 128>}, {pipeline_mode = #tpu.pipeline_mode<synchronous>, transform_indices = @transform_4, window_bounds = array<i64: 128, 128>}, {pipeline_mode = #tpu.pipeline_mode<synchronous>, transform_indices = @transform_5, window_bounds = array<i64: 4, 128>}]} {
    %c0_i32 = arith.constant 0 : i32
    %0 = arith.cmpi eq, %arg0, %c0_i32 : i32
    %1 = arith.extui %0 : i1 to i32
    %c0_i32_0 = arith.constant 0 : i32
    %2 = arith.cmpi ne, %1, %c0_i32_0 : i32
    scf.if %2 {
      %cst_9 = arith.constant 0.000000e+00 : f32
      %12 = vector.broadcast %cst_9 : f32 to vector<4x128xf32>
      %c0_10 = arith.constant 0 : index
      %c0_11 = arith.constant 0 : index
      %13 = vector.load %arg7[%c0_10, %c0_11] : memref<4x128xf32, #tpu.memory_space<vmem>>, vector<4x128xf32>
      tpu.vector_store %arg7[%c0_10, %c0_11], %12 {strides = array<i32>} : memref<4x128xf32, #tpu.memory_space<vmem>>, vector<4x128xf32>,
    } else {
    }
    %c0 = arith.constant 0 : index
    %c0_1 = arith.constant 0 : index
    %3 = vector.load %arg7[%c0, %c0_1] : memref<4x128xf32, #tpu.memory_space<vmem>>, vector<4x128xf32>
    %c0_2 = arith.constant 0 : index
    %c0_3 = arith.constant 0 : index
    %4 = vector.load %arg1[%c0_2, %c0_3] : memref<4x512xbf16, #tpu.memory_space<vmem>>, vector<4x512xbf16>
    %c0_4 = arith.constant 0 : index
    %c0_5 = arith.constant 0 : index
    %5 = vector.load %arg2[%c0_4, %c0_5] : memref<512x128xbf16, #tpu.memory_space<vmem>>, vector<512x128xbf16>
    %cst = arith.constant dense<0.000000e+00> : vector<4x128xf32>
    %6 = tpu.matmul %4, %5, %cst {dimension_numbers = #tpu.dot_dimension_numbers<[1], [0], [0], [1], [0, 0, 1, 1], [], []>} : vector<4x512xbf16>, vector<512x128xbf16>, vector<4x128xf32> -> vector<4x128xf32>
    %7 = arith.addf %3, %6 : vector<4x128xf32>
    %c0_6 = arith.constant 0 : index
    %c0_7 = arith.constant 0 : index
    %8 = vector.load %arg7[%c0_6, %c0_7] : memref<4x128xf32, #tpu.memory_space<vmem>>, vector<4x128xf32>
    tpu.vector_store %arg7[%c0_6, %c0_7], %7 {strides = array<i32>} : memref<4x128xf32, #tpu.memory_space<vmem>>, vector<4x128xf32>,
    %c1_i32 = arith.constant 1 : i32
    %9 = arith.cmpi eq, %arg0, %c1_i32 : i32
    %10 = arith.extui %9 : i1 to i32
    %c0_i32_8 = arith.constant 0 : i32
    %11 = arith.cmpi ne, %10, %c0_i32_8 : i32
    scf.if %11 {
      %c0_9 = arith.constant 0 : index
      %c0_10 = arith.constant 0 : index
      %12 = vector.load %arg7[%c0_9, %c0_10] : memref<4x128xf32, #tpu.memory_space<vmem>>, vector<4x128xf32>
      %13 = tpu.iota {dimensions = array<i32: 0>} : vector<4x128xi32>
      %c2_i32 = arith.constant 2 : i32
      %14 = vector.broadcast %c2_i32 : i32 to vector<4x128xi32>
      %15 = arith.cmpi slt, %13, %14 : vector<4x128xi32>
      %16 = arith.extui %15 : vector<4x128xi1> to vector<4x128xi32>
      %17 = arith.sitofp %16 : vector<4x128xi32> to vector<4x128xf32>
      %cst_11 = arith.constant 1.000000e+00 : f32
      %18 = vector.broadcast %cst_11 : f32 to vector<4x128xf32>
      %19 = arith.subf %18, %17 : vector<4x128xf32>
      %20 = arith.mulf %12, %17 : vector<4x128xf32>
      %cst_12 = arith.constant dense<0.000000e+00> : vector<128xf32>
      %21 = vector.multi_reduction <add>, %20, %cst_12 [0] : vector<4x128xf32> to vector<128xf32>
      %22 = vector.shape_cast %21 : vector<128xf32> to vector<1x128xf32>
      %cst_13 = arith.constant 5.000000e-01 : f32
      %23 = vector.broadcast %cst_13 : f32 to vector<1x128xf32>
      %24 = arith.mulf %22, %23 : vector<1x128xf32>
      %25 = arith.mulf %12, %12 : vector<4x128xf32>
      %26 = arith.mulf %25, %17 : vector<4x128xf32>
      %cst_14 = arith.constant dense<0.000000e+00> : vector<128xf32>
      %27 = vector.multi_reduction <add>, %26, %cst_14 [0] : vector<4x128xf32> to vector<128xf32>
      %28 = vector.shape_cast %27 : vector<128xf32> to vector<1x128xf32>
      %cst_15 = arith.constant 5.000000e-01 : f32
      %29 = vector.broadcast %cst_15 : f32 to vector<1x128xf32>
      %30 = arith.mulf %28, %29 : vector<1x128xf32>
      %31 = arith.mulf %24, %24 : vector<1x128xf32>
      %32 = arith.subf %30, %31 : vector<1x128xf32>
      %cst_16 = arith.constant 0.000000e+00 : f32
      %33 = vector.broadcast %cst_16 : f32 to vector<1x128xf32>
      %34 = arith.maximumf %32, %33 : vector<1x128xf32>
      %35 = arith.mulf %12, %19 : vector<4x128xf32>
      %cst_17 = arith.constant dense<0.000000e+00> : vector<128xf32>
      %36 = vector.multi_reduction <add>, %35, %cst_17 [0] : vector<4x128xf32> to vector<128xf32>
      %37 = vector.shape_cast %36 : vector<128xf32> to vector<1x128xf32>
      %cst_18 = arith.constant 5.000000e-01 : f32
      %38 = vector.broadcast %cst_18 : f32 to vector<1x128xf32>
      %39 = arith.mulf %37, %38 : vector<1x128xf32>
      %40 = arith.mulf %12, %12 : vector<4x128xf32>
      %41 = arith.mulf %40, %19 : vector<4x128xf32>
      %cst_19 = arith.constant dense<0.000000e+00> : vector<128xf32>
      %42 = vector.multi_reduction <add>, %41, %cst_19 [0] : vector<4x128xf32> to vector<128xf32>
      %43 = vector.shape_cast %42 : vector<128xf32> to vector<1x128xf32>
      %cst_20 = arith.constant 5.000000e-01 : f32
      %44 = vector.broadcast %cst_20 : f32 to vector<1x128xf32>
      %45 = arith.mulf %43, %44 : vector<1x128xf32>
      %46 = arith.mulf %39, %39 : vector<1x128xf32>
      %47 = arith.subf %45, %46 : vector<1x128xf32>
      %cst_21 = arith.constant 0.000000e+00 : f32
      %48 = vector.broadcast %cst_21 : f32 to vector<1x128xf32>
      %49 = arith.maximumf %47, %48 : vector<1x128xf32>
      %50 = vector.shape_cast %24 : vector<1x128xf32> to vector<1x128xf32>
      %51 = vector.broadcast %50 : vector<1x128xf32> to vector<4x128xf32>
      %52 = vector.shape_cast %39 : vector<1x128xf32> to vector<1x128xf32>
      %53 = vector.broadcast %52 : vector<1x128xf32> to vector<4x128xf32>
      %54 = arith.select %15, %51, %53 : vector<4x128xi1>, vector<4x128xf32>
      %55 = vector.shape_cast %34 : vector<1x128xf32> to vector<1x128xf32>
      %56 = vector.broadcast %55 : vector<1x128xf32> to vector<4x128xf32>
      %57 = vector.shape_cast %49 : vector<1x128xf32> to vector<1x128xf32>
      %58 = vector.broadcast %57 : vector<1x128xf32> to vector<4x128xf32>
      %59 = arith.select %15, %56, %58 : vector<4x128xi1>, vector<4x128xf32>
      %60 = arith.subf %12, %54 : vector<4x128xf32>
      %cst_22 = arith.constant 9.99999974E-6 : f32
      %61 = vector.broadcast %cst_22 : f32 to vector<4x128xf32>
      %62 = arith.addf %59, %61 : vector<4x128xf32>
      %63 = math.rsqrt %62 : vector<4x128xf32>
      %64 = arith.mulf %60, %63 : vector<4x128xf32>
      %c0_23 = arith.constant 0 : index
      %c0_24 = arith.constant 0 : index
      %65 = vector.load %arg3[%c0_23, %c0_24] : memref<1x128xf32, #tpu.memory_space<vmem>>, vector<1x128xf32>
      %66 = vector.broadcast %65 : vector<1x128xf32> to vector<4x128xf32>
      %67 = arith.mulf %64, %66 : vector<4x128xf32>
      %c0_25 = arith.constant 0 : index
      %c0_26 = arith.constant 0 : index
      %68 = vector.load %arg4[%c0_25, %c0_26] : memref<1x128xf32, #tpu.memory_space<vmem>>, vector<1x128xf32>
      %69 = vector.broadcast %68 : vector<1x128xf32> to vector<4x128xf32>
      %70 = arith.addf %67, %69 : vector<4x128xf32>
      %cst_27 = arith.constant 0.000000e+00 : f32
      %71 = vector.broadcast %cst_27 : f32 to vector<4x128xf32>
      %72 = arith.maximumf %70, %71 : vector<4x128xf32>
      %73 = arith.truncf %72 : vector<4x128xf32> to vector<4x128xbf16>
      %c0_28 = arith.constant 0 : index
      %c0_29 = arith.constant 0 : index
      %74 = vector.load %arg5[%c0_28, %c0_29] : memref<128x128xbf16, #tpu.memory_space<vmem>>, vector<128x128xbf16>
      %cst_30 = arith.constant dense<0.000000e+00> : vector<4x128xf32>
      %75 = tpu.matmul %73, %74, %cst_30 {dimension_numbers = #tpu.dot_dimension_numbers<[1], [0], [0], [1], [0, 0, 1, 1], [], []>} : vector<4x128xbf16>, vector<128x128xbf16>, vector<4x128xf32> -> vector<4x128xf32>
      %76 = tpu.iota {dimensions = array<i32: 0>} : vector<4x128xi32>
      %c2_i32_31 = arith.constant 2 : i32
      %77 = vector.broadcast %c2_i32_31 : i32 to vector<4x128xi32>
      %78 = arith.cmpi slt, %76, %77 : vector<4x128xi32>
      %79 = arith.extui %78 : vector<4x128xi1> to vector<4x128xi32>
      %80 = arith.sitofp %79 : vector<4x128xi32> to vector<4x128xf32>
      %cst_32 = arith.constant 1.000000e+00 : f32
      %81 = vector.broadcast %cst_32 : f32 to vector<4x128xf32>
      %82 = arith.subf %81, %80 : vector<4x128xf32>
      %83 = arith.mulf %75, %80 : vector<4x128xf32>
      %cst_33 = arith.constant dense<0.000000e+00> : vector<128xf32>
      %84 = vector.multi_reduction <add>, %83, %cst_33 [0] : vector<4x128xf32> to vector<128xf32>
      %85 = vector.shape_cast %84 : vector<128xf32> to vector<1x128xf32>
      %cst_34 = arith.constant 5.000000e-01 : f32
      %86 = vector.broadcast %cst_34 : f32 to vector<1x128xf32>
      %87 = arith.mulf %85, %86 : vector<1x128xf32>
      %88 = arith.mulf %75, %75 : vector<4x128xf32>
      %89 = arith.mulf %88, %80 : vector<4x128xf32>
      %cst_35 = arith.constant dense<0.000000e+00> : vector<128xf32>
      %90 = vector.multi_reduction <add>, %89, %cst_35 [0] : vector<4x128xf32> to vector<128xf32>
      %91 = vector.shape_cast %90 : vector<128xf32> to vector<1x128xf32>
      %cst_36 = arith.constant 5.000000e-01 : f32
      %92 = vector.broadcast %cst_36 : f32 to vector<1x128xf32>
      %93 = arith.mulf %91, %92 : vector<1x128xf32>
      %94 = arith.mulf %87, %87 : vector<1x128xf32>
      %95 = arith.subf %93, %94 : vector<1x128xf32>
      %cst_37 = arith.constant 0.000000e+00 : f32
      %96 = vector.broadcast %cst_37 : f32 to vector<1x128xf32>
      %97 = arith.maximumf %95, %96 : vector<1x128xf32>
      %98 = arith.mulf %75, %82 : vector<4x128xf32>
      %cst_38 = arith.constant dense<0.000000e+00> : vector<128xf32>
      %99 = vector.multi_reduction <add>, %98, %cst_38 [0] : vector<4x128xf32> to vector<128xf32>
      %100 = vector.shape_cast %99 : vector<128xf32> to vector<1x128xf32>
      %cst_39 = arith.constant 5.000000e-01 : f32
      %101 = vector.broadcast %cst_39 : f32 to vector<1x128xf32>
      %102 = arith.mulf %100, %101 : vector<1x128xf32>
      %103 = arith.mulf %75, %75 : vector<4x128xf32>
      %104 = arith.mulf %103, %82 : vector<4x128xf32>
      %cst_40 = arith.constant dense<0.000000e+00> : vector<128xf32>
      %105 = vector.multi_reduction <add>, %104, %cst_40 [0] : vector<4x128xf32> to vector<128xf32>
      %106 = vector.shape_cast %105 : vector<128xf32> to vector<1x128xf32>
      %cst_41 = arith.constant 5.000000e-01 : f32
      %107 = vector.broadcast %cst_41 : f32 to vector<1x128xf32>
      %108 = arith.mulf %106, %107 : vector<1x128xf32>
      %109 = arith.mulf %102, %102 : vector<1x128xf32>
      %110 = arith.subf %108, %109 : vector<1x128xf32>
      %cst_42 = arith.constant 0.000000e+00 : f32
      %111 = vector.broadcast %cst_42 : f32 to vector<1x128xf32>
      %112 = arith.maximumf %110, %111 : vector<1x128xf32>
      %113 = vector.shape_cast %87 : vector<1x128xf32> to vector<1x128xf32>
      %114 = vector.broadcast %113 : vector<1x128xf32> to vector<4x128xf32>
      %115 = vector.shape_cast %102 : vector<1x128xf32> to vector<1x128xf32>
      %116 = vector.broadcast %115 : vector<1x128xf32> to vector<4x128xf32>
      %117 = arith.select %78, %114, %116 : vector<4x128xi1>, vector<4x128xf32>
      %118 = vector.shape_cast %97 : vector<1x128xf32> to vector<1x128xf32>
      %119 = vector.broadcast %118 : vector<1x128xf32> to vector<4x128xf32>
      %120 = vector.shape_cast %112 : vector<1x128xf32> to vector<1x128xf32>
      %121 = vector.broadcast %120 : vector<1x128xf32> to vector<4x128xf32>
      %122 = arith.select %78, %119, %121 : vector<4x128xi1>, vector<4x128xf32>
      %123 = arith.subf %75, %117 : vector<4x128xf32>
      %cst_43 = arith.constant 9.99999974E-6 : f32
      %124 = vector.broadcast %cst_43 : f32 to vector<4x128xf32>
      %125 = arith.addf %122, %124 : vector<4x128xf32>
      %126 = math.rsqrt %125 : vector<4x128xf32>
      %127 = arith.mulf %123, %126 : vector<4x128xf32>
      %c0_44 = arith.constant 0 : index
      %c0_45 = arith.constant 0 : index
      %128 = vector.load %arg6[%c0_44, %c0_45] : memref<4x128xf32, #tpu.memory_space<vmem>>, vector<4x128xf32>
      tpu.vector_store %arg6[%c0_44, %c0_45], %127 {strides = array<i32>} : memref<4x128xf32, #tpu.memory_space<vmem>>, vector<4x128xf32>,
    } else {
    }
    return
  }
  func.func @transform_0(%arg0: i32) -> (i32, i32) {
    %c0_i32 = arith.constant 0 : i32
    %c0_i32_0 = arith.constant 0 : i32
    return %c0_i32, %arg0 : i32, i32
  }
  func.func @transform_1(%arg0: i32) -> (i32, i32) {
    %c0_i32 = arith.constant 0 : i32
    %c0_i32_0 = arith.constant 0 : i32
    return %arg0, %c0_i32 : i32, i32
  }
  func.func @transform_2(%arg0: i32) -> (i32, i32) {
    %c0_i32 = arith.constant 0 : i32
    %c0_i32_0 = arith.constant 0 : i32
    %c0_i32_1 = arith.constant 0 : i32
    return %c0_i32, %c0_i32_0 : i32, i32
  }
  func.func @transform_3(%arg0: i32) -> (i32, i32) {
    %c0_i32 = arith.constant 0 : i32
    %c0_i32_0 = arith.constant 0 : i32
    %c0_i32_1 = arith.constant 0 : i32
    return %c0_i32, %c0_i32_0 : i32, i32
  }
  func.func @transform_4(%arg0: i32) -> (i32, i32) {
    %c0_i32 = arith.constant 0 : i32
    %c0_i32_0 = arith.constant 0 : i32
    %c0_i32_1 = arith.constant 0 : i32
    return %c0_i32, %c0_i32_0 : i32, i32
  }
  func.func @transform_5(%arg0: i32) -> (i32, i32) {
    %c0_i32 = arith.constant 0 : i32
    %c0_i32_0 = arith.constant 0 : i32
    %c0_i32_1 = arith.constant 0 : i32
    return %c0_i32, %c0_i32_0 : i32, i32
  }
}

module attributes {stable_mosaic.version = 11 : i64} {
  func.func @_fused_mlp_kernel(%arg0: i32, %arg1: memref<4x128xbf16, #tpu.memory_space<vmem>>, %arg2: memref<128x128xbf16, #tpu.memory_space<vmem>>, %arg3: memref<1x128xf32, #tpu.memory_space<vmem>>, %arg4: memref<1x128xf32, #tpu.memory_space<vmem>>, %arg5: memref<128x128xbf16, #tpu.memory_space<vmem>>, %arg6: memref<4x128xf32, #tpu.memory_space<vmem>>, %arg7: memref<4x128xf32, #tpu.memory_space<vmem>>) attributes {dimension_semantics = [#tpu.dimension_semantics<arbitrary>], iteration_bounds = array<i64: 1>, scalar_prefetch = 0 : i64, scratch_operands = 1 : i64, tpu.core_type = #tpu.core_type<tc>, window_params = [{transform_indices = @transform_0, window_bounds = array<i64: 4, 128>}, {transform_indices = @transform_1, window_bounds = array<i64: 128, 128>}, {pipeline_mode = #tpu.pipeline_mode<synchronous>, transform_indices = @transform_2, window_bounds = array<i64: 1, 128>}, {pipeline_mode = #tpu.pipeline_mode<synchronous>, transform_indices = @transform_3, window_bounds = array<i64: 1, 128>}, {pipeline_mode = #tpu.pipeline_mode<synchronous>, transform_indices = @transform_4, window_bounds = array<i64: 128, 128>}, {pipeline_mode = #tpu.pipeline_mode<synchronous>, transform_indices = @transform_5, window_bounds = array<i64: 4, 128>}]} {
    %c0_i32 = arith.constant 0 : i32
    %0 = arith.cmpi eq, %arg0, %c0_i32 : i32
    %1 = arith.extui %0 : i1 to i32
    %c0_i32_0 = arith.constant 0 : i32
    %2 = arith.cmpi ne, %1, %c0_i32_0 : i32
    scf.if %2 {
      %cst_10 = arith.constant 0.000000e+00 : f32
      %12 = vector.broadcast %cst_10 : f32 to vector<4x128xf32>
      %c0_11 = arith.constant 0 : index
      %c0_12 = arith.constant 0 : index
      %13 = vector.load %arg7[%c0_11, %c0_12] : memref<4x128xf32, #tpu.memory_space<vmem>>, vector<4x128xf32>
      tpu.vector_store %arg7[%c0_11, %c0_12], %12 {strides = array<i32>} : memref<4x128xf32, #tpu.memory_space<vmem>>, vector<4x128xf32>,
    } else {
    }
    %c0 = arith.constant 0 : index
    %c0_1 = arith.constant 0 : index
    %3 = vector.load %arg7[%c0, %c0_1] : memref<4x128xf32, #tpu.memory_space<vmem>>, vector<4x128xf32>
    %c0_2 = arith.constant 0 : index
    %c0_3 = arith.constant 0 : index
    %4 = vector.load %arg1[%c0_2, %c0_3] : memref<4x128xbf16, #tpu.memory_space<vmem>>, vector<4x128xbf16>
    %c0_4 = arith.constant 0 : index
    %c0_5 = arith.constant 0 : index
    %5 = vector.load %arg2[%c0_4, %c0_5] : memref<128x128xbf16, #tpu.memory_space<vmem>>, vector<128x128xbf16>
    %cst = arith.constant dense<0.000000e+00> : vector<4x128xf32>
    %6 = tpu.matmul %4, %5, %cst {dimension_numbers = #tpu.dot_dimension_numbers<[1], [0], [0], [1], [0, 0, 1, 1], [], []>} : vector<4x128xbf16>, vector<128x128xbf16>, vector<4x128xf32> -> vector<4x128xf32>
    %7 = arith.addf %3, %6 : vector<4x128xf32>
    %c0_6 = arith.constant 0 : index
    %c0_7 = arith.constant 0 : index
    %8 = vector.load %arg7[%c0_6, %c0_7] : memref<4x128xf32, #tpu.memory_space<vmem>>, vector<4x128xf32>
    tpu.vector_store %arg7[%c0_6, %c0_7], %7 {strides = array<i32>} : memref<4x128xf32, #tpu.memory_space<vmem>>, vector<4x128xf32>,
    %c0_i32_8 = arith.constant 0 : i32
    %9 = arith.cmpi eq, %arg0, %c0_i32_8 : i32
    %10 = arith.extui %9 : i1 to i32
    %c0_i32_9 = arith.constant 0 : i32
    %11 = arith.cmpi ne, %10, %c0_i32_9 : i32
    scf.if %11 {
      %c0_10 = arith.constant 0 : index
      %c0_11 = arith.constant 0 : index
      %12 = vector.load %arg7[%c0_10, %c0_11] : memref<4x128xf32, #tpu.memory_space<vmem>>, vector<4x128xf32>
      %13 = tpu.iota {dimensions = array<i32: 0>} : vector<4x128xi32>
      %c2_i32 = arith.constant 2 : i32
      %14 = vector.broadcast %c2_i32 : i32 to vector<4x128xi32>
      %15 = arith.cmpi slt, %13, %14 : vector<4x128xi32>
      %16 = arith.extui %15 : vector<4x128xi1> to vector<4x128xi32>
      %17 = arith.sitofp %16 : vector<4x128xi32> to vector<4x128xf32>
      %cst_12 = arith.constant 1.000000e+00 : f32
      %18 = vector.broadcast %cst_12 : f32 to vector<4x128xf32>
      %19 = arith.subf %18, %17 : vector<4x128xf32>
      %20 = arith.mulf %12, %17 : vector<4x128xf32>
      %cst_13 = arith.constant dense<0.000000e+00> : vector<128xf32>
      %21 = vector.multi_reduction <add>, %20, %cst_13 [0] : vector<4x128xf32> to vector<128xf32>
      %22 = vector.shape_cast %21 : vector<128xf32> to vector<1x128xf32>
      %cst_14 = arith.constant 5.000000e-01 : f32
      %23 = vector.broadcast %cst_14 : f32 to vector<1x128xf32>
      %24 = arith.mulf %22, %23 : vector<1x128xf32>
      %25 = arith.mulf %12, %12 : vector<4x128xf32>
      %26 = arith.mulf %25, %17 : vector<4x128xf32>
      %cst_15 = arith.constant dense<0.000000e+00> : vector<128xf32>
      %27 = vector.multi_reduction <add>, %26, %cst_15 [0] : vector<4x128xf32> to vector<128xf32>
      %28 = vector.shape_cast %27 : vector<128xf32> to vector<1x128xf32>
      %cst_16 = arith.constant 5.000000e-01 : f32
      %29 = vector.broadcast %cst_16 : f32 to vector<1x128xf32>
      %30 = arith.mulf %28, %29 : vector<1x128xf32>
      %31 = arith.mulf %24, %24 : vector<1x128xf32>
      %32 = arith.subf %30, %31 : vector<1x128xf32>
      %cst_17 = arith.constant 0.000000e+00 : f32
      %33 = vector.broadcast %cst_17 : f32 to vector<1x128xf32>
      %34 = arith.maximumf %32, %33 : vector<1x128xf32>
      %35 = arith.mulf %12, %19 : vector<4x128xf32>
      %cst_18 = arith.constant dense<0.000000e+00> : vector<128xf32>
      %36 = vector.multi_reduction <add>, %35, %cst_18 [0] : vector<4x128xf32> to vector<128xf32>
      %37 = vector.shape_cast %36 : vector<128xf32> to vector<1x128xf32>
      %cst_19 = arith.constant 5.000000e-01 : f32
      %38 = vector.broadcast %cst_19 : f32 to vector<1x128xf32>
      %39 = arith.mulf %37, %38 : vector<1x128xf32>
      %40 = arith.mulf %12, %12 : vector<4x128xf32>
      %41 = arith.mulf %40, %19 : vector<4x128xf32>
      %cst_20 = arith.constant dense<0.000000e+00> : vector<128xf32>
      %42 = vector.multi_reduction <add>, %41, %cst_20 [0] : vector<4x128xf32> to vector<128xf32>
      %43 = vector.shape_cast %42 : vector<128xf32> to vector<1x128xf32>
      %cst_21 = arith.constant 5.000000e-01 : f32
      %44 = vector.broadcast %cst_21 : f32 to vector<1x128xf32>
      %45 = arith.mulf %43, %44 : vector<1x128xf32>
      %46 = arith.mulf %39, %39 : vector<1x128xf32>
      %47 = arith.subf %45, %46 : vector<1x128xf32>
      %cst_22 = arith.constant 0.000000e+00 : f32
      %48 = vector.broadcast %cst_22 : f32 to vector<1x128xf32>
      %49 = arith.maximumf %47, %48 : vector<1x128xf32>
      %50 = vector.shape_cast %24 : vector<1x128xf32> to vector<1x128xf32>
      %51 = vector.broadcast %50 : vector<1x128xf32> to vector<4x128xf32>
      %52 = vector.shape_cast %39 : vector<1x128xf32> to vector<1x128xf32>
      %53 = vector.broadcast %52 : vector<1x128xf32> to vector<4x128xf32>
      %54 = arith.select %15, %51, %53 : vector<4x128xi1>, vector<4x128xf32>
      %55 = vector.shape_cast %34 : vector<1x128xf32> to vector<1x128xf32>
      %56 = vector.broadcast %55 : vector<1x128xf32> to vector<4x128xf32>
      %57 = vector.shape_cast %49 : vector<1x128xf32> to vector<1x128xf32>
      %58 = vector.broadcast %57 : vector<1x128xf32> to vector<4x128xf32>
      %59 = arith.select %15, %56, %58 : vector<4x128xi1>, vector<4x128xf32>
      %60 = arith.subf %12, %54 : vector<4x128xf32>
      %cst_23 = arith.constant 9.99999974E-6 : f32
      %61 = vector.broadcast %cst_23 : f32 to vector<4x128xf32>
      %62 = arith.addf %59, %61 : vector<4x128xf32>
      %63 = math.rsqrt %62 : vector<4x128xf32>
      %64 = arith.mulf %60, %63 : vector<4x128xf32>
      %c0_24 = arith.constant 0 : index
      %c0_25 = arith.constant 0 : index
      %65 = vector.load %arg3[%c0_24, %c0_25] : memref<1x128xf32, #tpu.memory_space<vmem>>, vector<1x128xf32>
      %66 = vector.broadcast %65 : vector<1x128xf32> to vector<4x128xf32>
      %67 = arith.mulf %64, %66 : vector<4x128xf32>
      %c0_26 = arith.constant 0 : index
      %c0_27 = arith.constant 0 : index
      %68 = vector.load %arg4[%c0_26, %c0_27] : memref<1x128xf32, #tpu.memory_space<vmem>>, vector<1x128xf32>
      %69 = vector.broadcast %68 : vector<1x128xf32> to vector<4x128xf32>
      %70 = arith.addf %67, %69 : vector<4x128xf32>
      %cst_28 = arith.constant 0.000000e+00 : f32
      %71 = vector.broadcast %cst_28 : f32 to vector<4x128xf32>
      %72 = arith.maximumf %70, %71 : vector<4x128xf32>
      %73 = arith.truncf %72 : vector<4x128xf32> to vector<4x128xbf16>
      %c0_29 = arith.constant 0 : index
      %c0_30 = arith.constant 0 : index
      %74 = vector.load %arg5[%c0_29, %c0_30] : memref<128x128xbf16, #tpu.memory_space<vmem>>, vector<128x128xbf16>
      %cst_31 = arith.constant dense<0.000000e+00> : vector<4x128xf32>
      %75 = tpu.matmul %73, %74, %cst_31 {dimension_numbers = #tpu.dot_dimension_numbers<[1], [0], [0], [1], [0, 0, 1, 1], [], []>} : vector<4x128xbf16>, vector<128x128xbf16>, vector<4x128xf32> -> vector<4x128xf32>
      %c0_32 = arith.constant 0 : index
      %c0_33 = arith.constant 0 : index
      %76 = vector.load %arg6[%c0_32, %c0_33] : memref<4x128xf32, #tpu.memory_space<vmem>>, vector<4x128xf32>
      tpu.vector_store %arg6[%c0_32, %c0_33], %75 {strides = array<i32>} : memref<4x128xf32, #tpu.memory_space<vmem>>, vector<4x128xf32>,
    } else {
    }
    return
  }
  func.func @transform_0(%arg0: i32) -> (i32, i32) {
    %c0_i32 = arith.constant 0 : i32
    %c0_i32_0 = arith.constant 0 : i32
    return %c0_i32, %arg0 : i32, i32
  }
  func.func @transform_1(%arg0: i32) -> (i32, i32) {
    %c0_i32 = arith.constant 0 : i32
    %c0_i32_0 = arith.constant 0 : i32
    return %arg0, %c0_i32 : i32, i32
  }
  func.func @transform_2(%arg0: i32) -> (i32, i32) {
    %c0_i32 = arith.constant 0 : i32
    %c0_i32_0 = arith.constant 0 : i32
    %c0_i32_1 = arith.constant 0 : i32
    return %c0_i32, %c0_i32_0 : i32, i32
  }
  func.func @transform_3(%arg0: i32) -> (i32, i32) {
    %c0_i32 = arith.constant 0 : i32
    %c0_i32_0 = arith.constant 0 : i32
    %c0_i32_1 = arith.constant 0 : i32
    return %c0_i32, %c0_i32_0 : i32, i32
  }
  func.func @transform_4(%arg0: i32) -> (i32, i32) {
    %c0_i32 = arith.constant 0 : i32
    %c0_i32_0 = arith.constant 0 : i32
    %c0_i32_1 = arith.constant 0 : i32
    return %c0_i32, %c0_i32_0 : i32, i32
  }
  func.func @transform_5(%arg0: i32) -> (i32, i32) {
    %c0_i32 = arith.constant 0 : i32
    %c0_i32_0 = arith.constant 0 : i32
    %c0_i32_1 = arith.constant 0 : i32
    return %c0_i32, %c0_i32_0 : i32, i32
  }
}

module attributes {stable_mosaic.version = 11 : i64} {
  func.func @_moco_loss_kernel(%arg0: memref<2x128xf32, #tpu.memory_space<vmem>>, %arg1: memref<2x128xf32, #tpu.memory_space<vmem>>, %arg2: memref<2x128xf32, #tpu.memory_space<vmem>>, %arg3: memref<2x128xf32, #tpu.memory_space<vmem>>, %arg4: memref<1x1xf32, #tpu.memory_space<smem>>) attributes {dimension_semantics = [], scalar_prefetch = 0 : i64, scratch_operands = 0 : i64, tpu.core_type = #tpu.core_type<tc>} {
    %c0 = arith.constant 0 : index
    %c0_0 = arith.constant 0 : index
    %0 = vector.load %arg0[%c0, %c0_0] : memref<2x128xf32, #tpu.memory_space<vmem>>, vector<2x128xf32>
    %1 = arith.mulf %0, %0 : vector<2x128xf32>
    %cst = arith.constant dense<0.000000e+00> : vector<2xf32>
    %2 = vector.multi_reduction <add>, %1, %cst [1] : vector<2x128xf32> to vector<2xf32>
    %3 = vector.shape_cast %2 : vector<2xf32> to vector<2x1xf32>
    %cst_1 = arith.constant 1.000000e-24 : f32
    %4 = vector.broadcast %cst_1 : f32 to vector<2x1xf32>
    %5 = arith.maximumf %3, %4 : vector<2x1xf32>
    %6 = math.rsqrt %5 : vector<2x1xf32>
    %7 = vector.broadcast %6 : vector<2x1xf32> to vector<2x128xf32>
    %8 = arith.mulf %0, %7 : vector<2x128xf32>
    %c0_2 = arith.constant 0 : index
    %c0_3 = arith.constant 0 : index
    %9 = vector.load %arg1[%c0_2, %c0_3] : memref<2x128xf32, #tpu.memory_space<vmem>>, vector<2x128xf32>
    %10 = arith.mulf %9, %9 : vector<2x128xf32>
    %cst_4 = arith.constant dense<0.000000e+00> : vector<2xf32>
    %11 = vector.multi_reduction <add>, %10, %cst_4 [1] : vector<2x128xf32> to vector<2xf32>
    %12 = vector.shape_cast %11 : vector<2xf32> to vector<2x1xf32>
    %cst_5 = arith.constant 1.000000e-24 : f32
    %13 = vector.broadcast %cst_5 : f32 to vector<2x1xf32>
    %14 = arith.maximumf %12, %13 : vector<2x1xf32>
    %15 = math.rsqrt %14 : vector<2x1xf32>
    %16 = vector.broadcast %15 : vector<2x1xf32> to vector<2x128xf32>
    %17 = arith.mulf %9, %16 : vector<2x128xf32>
    %c0_6 = arith.constant 0 : index
    %c0_7 = arith.constant 0 : index
    %18 = vector.load %arg2[%c0_6, %c0_7] : memref<2x128xf32, #tpu.memory_space<vmem>>, vector<2x128xf32>
    %19 = arith.mulf %18, %18 : vector<2x128xf32>
    %cst_8 = arith.constant dense<0.000000e+00> : vector<2xf32>
    %20 = vector.multi_reduction <add>, %19, %cst_8 [1] : vector<2x128xf32> to vector<2xf32>
    %21 = vector.shape_cast %20 : vector<2xf32> to vector<2x1xf32>
    %cst_9 = arith.constant 1.000000e-24 : f32
    %22 = vector.broadcast %cst_9 : f32 to vector<2x1xf32>
    %23 = arith.maximumf %21, %22 : vector<2x1xf32>
    %24 = math.rsqrt %23 : vector<2x1xf32>
    %25 = vector.broadcast %24 : vector<2x1xf32> to vector<2x128xf32>
    %26 = arith.mulf %18, %25 : vector<2x128xf32>
    %c0_10 = arith.constant 0 : index
    %c0_11 = arith.constant 0 : index
    %27 = vector.load %arg3[%c0_10, %c0_11] : memref<2x128xf32, #tpu.memory_space<vmem>>, vector<2x128xf32>
    %28 = arith.mulf %27, %27 : vector<2x128xf32>
    %cst_12 = arith.constant dense<0.000000e+00> : vector<2xf32>
    %29 = vector.multi_reduction <add>, %28, %cst_12 [1] : vector<2x128xf32> to vector<2xf32>
    %30 = vector.shape_cast %29 : vector<2xf32> to vector<2x1xf32>
    %cst_13 = arith.constant 1.000000e-24 : f32
    %31 = vector.broadcast %cst_13 : f32 to vector<2x1xf32>
    %32 = arith.maximumf %30, %31 : vector<2x1xf32>
    %33 = math.rsqrt %32 : vector<2x1xf32>
    %34 = vector.broadcast %33 : vector<2x1xf32> to vector<2x128xf32>
    %35 = arith.mulf %27, %34 : vector<2x128xf32>
    %cst_14 = arith.constant dense<0.000000e+00> : vector<2x2xf32>
    %36 = tpu.matmul %8, %35, %cst_14 {dimension_numbers = #tpu.dot_dimension_numbers<[1], [1], [0], [0], [0, 0, 1, 0], [], []>} : vector<2x128xf32>, vector<2x128xf32>, vector<2x2xf32> -> vector<2x2xf32>
    %cst_15 = arith.constant 1.000000e+00 : f32
    %37 = vector.broadcast %cst_15 : f32 to vector<2x2xf32>
    %38 = arith.divf %36, %37 : vector<2x2xf32>
    %39 = arith.mulf %8, %35 : vector<2x128xf32>
    %cst_16 = arith.constant dense<0.000000e+00> : vector<2xf32>
    %40 = vector.multi_reduction <add>, %39, %cst_16 [1] : vector<2x128xf32> to vector<2xf32>
    %41 = vector.shape_cast %40 : vector<2xf32> to vector<2x1xf32>
    %cst_17 = arith.constant 1.000000e+00 : f32
    %42 = vector.broadcast %cst_17 : f32 to vector<2x1xf32>
    %43 = arith.divf %41, %42 : vector<2x1xf32>
    %cst_18 = arith.constant dense<0xFF800000> : vector<2xf32>
    %44 = vector.multi_reduction <maximumf>, %38, %cst_18 [1] : vector<2x2xf32> to vector<2xf32>
    %45 = vector.shape_cast %44 : vector<2xf32> to vector<2x1xf32>
    %46 = vector.broadcast %45 : vector<2x1xf32> to vector<2x2xf32>
    %47 = arith.subf %38, %46 : vector<2x2xf32>
    %48 = math.exp %47 : vector<2x2xf32>
    %cst_19 = arith.constant dense<0.000000e+00> : vector<2xf32>
    %49 = vector.multi_reduction <add>, %48, %cst_19 [1] : vector<2x2xf32> to vector<2xf32>
    %50 = vector.shape_cast %49 : vector<2xf32> to vector<2x1xf32>
    %51 = math.log %50 : vector<2x1xf32>
    %52 = arith.addf %45, %51 : vector<2x1xf32>
    %53 = arith.subf %52, %43 : vector<2x1xf32>
    %54 = vector.shape_cast %53 : vector<2x1xf32> to vector<1x2x1xf32>
    %cst_20 = arith.constant dense<0.000000e+00> : vector<1xf32>
    %55 = vector.multi_reduction <add>, %54, %cst_20 [1, 2] : vector<1x2x1xf32> to vector<1xf32>
    %56 = vector.shape_cast %55 : vector<1xf32> to vector<1x1x1xf32>
    %57 = vector.extract %56[0, 0, 0] : f32 from vector<1x1x1xf32>
    %cst_21 = arith.constant 1.000000e+00 : f32
    %58 = arith.mulf %57, %cst_21 : f32
    %cst_22 = arith.constant dense<0.000000e+00> : vector<2x2xf32>
    %59 = tpu.matmul %17, %26, %cst_22 {dimension_numbers = #tpu.dot_dimension_numbers<[1], [1], [0], [0], [0, 0, 1, 0], [], []>} : vector<2x128xf32>, vector<2x128xf32>, vector<2x2xf32> -> vector<2x2xf32>
    %cst_23 = arith.constant 1.000000e+00 : f32
    %60 = vector.broadcast %cst_23 : f32 to vector<2x2xf32>
    %61 = arith.divf %59, %60 : vector<2x2xf32>
    %62 = arith.mulf %17, %26 : vector<2x128xf32>
    %cst_24 = arith.constant dense<0.000000e+00> : vector<2xf32>
    %63 = vector.multi_reduction <add>, %62, %cst_24 [1] : vector<2x128xf32> to vector<2xf32>
    %64 = vector.shape_cast %63 : vector<2xf32> to vector<2x1xf32>
    %cst_25 = arith.constant 1.000000e+00 : f32
    %65 = vector.broadcast %cst_25 : f32 to vector<2x1xf32>
    %66 = arith.divf %64, %65 : vector<2x1xf32>
    %cst_26 = arith.constant dense<0xFF800000> : vector<2xf32>
    %67 = vector.multi_reduction <maximumf>, %61, %cst_26 [1] : vector<2x2xf32> to vector<2xf32>
    %68 = vector.shape_cast %67 : vector<2xf32> to vector<2x1xf32>
    %69 = vector.broadcast %68 : vector<2x1xf32> to vector<2x2xf32>
    %70 = arith.subf %61, %69 : vector<2x2xf32>
    %71 = math.exp %70 : vector<2x2xf32>
    %cst_27 = arith.constant dense<0.000000e+00> : vector<2xf32>
    %72 = vector.multi_reduction <add>, %71, %cst_27 [1] : vector<2x2xf32> to vector<2xf32>
    %73 = vector.shape_cast %72 : vector<2xf32> to vector<2x1xf32>
    %74 = math.log %73 : vector<2x1xf32>
    %75 = arith.addf %68, %74 : vector<2x1xf32>
    %76 = arith.subf %75, %66 : vector<2x1xf32>
    %77 = vector.shape_cast %76 : vector<2x1xf32> to vector<1x2x1xf32>
    %cst_28 = arith.constant dense<0.000000e+00> : vector<1xf32>
    %78 = vector.multi_reduction <add>, %77, %cst_28 [1, 2] : vector<1x2x1xf32> to vector<1xf32>
    %79 = vector.shape_cast %78 : vector<1xf32> to vector<1x1x1xf32>
    %80 = vector.extract %79[0, 0, 0] : f32 from vector<1x1x1xf32>
    %cst_29 = arith.constant 1.000000e+00 : f32
    %81 = arith.mulf %80, %cst_29 : f32
    %82 = arith.addf %58, %81 : f32
    %c0_30 = arith.constant 0 : index
    %c0_31 = arith.constant 0 : index
    %83 = memref.load %arg4[%c0_30, %c0_31] : memref<1x1xf32, #tpu.memory_space<smem>>
    memref.store %82, %arg4[%c0_30, %c0_31] : memref<1x1xf32, #tpu.memory_space<smem>>
    return
  }
}

</mosaic_0001>

<bundles_post_ra>
// kernel: moco_forward.6
= control target key start
LH: loop header
LB: loop body
LE: loop exit
PB: predicated region body
PF: predicated region fallthrough
CT: control target
= control target key end

     0   :  { %v418_v0 = vmov 0.0   ;;  %vm419_vm0 = vmmov 0   ;;  %v138_v18 = vlaneseq  ;;  %vm145_vm2 = vcmask 1043456   ;;  %s533_s1 = inlined_call_operand.vmem [shape: bf16[128,128], index: 1, kind: input, shape index: {}]   ;;  %s534_s0 = inlined_call_operand.vmem [shape: bf16[4,128], index: 0, kind: input, shape index: {}]   ;;  %s535_s4 = inlined_call_operand.vmem [shape: bf16[128,128], index: 4, kind: input, shape index: {}]   ;;  %s536_s2 = inlined_call_operand.vmem [shape: f32[1,128], index: 2, kind: input, shape index: {}]   ;;  %s537_s3 = inlined_call_operand.vmem [shape: f32[1,128], index: 3, kind: input, shape index: {}]   ;;  %s538_s5 = inlined_call_operand.vmem [shape: f32[4,128], index: 5, kind: output, shape index: {}]  }
   0x1   :  { %358 = vmatprep.subr.bf16.mxu0 %v418_v0  ;;  %25 = vst [vmem:[#allocation2] sm:$0xf] %v418_v0  ;;  %v400_v1 = vld [vmem:[%s533_s1] sm:$0xff]   ;;  %374 = vmatprep.mubr.msk.bf16.mxu0 %vm419_vm0, %v418_v0  ;;  %v401_v2 = vld [vmem:[%s533_s1 + $0x8] sm:$0xff]   ;;  %v402_v3 = vld [vmem:[%s533_s1 + $0x10] sm:$0xff]  }
   0x2   :  { %378 = vmatprep.subr.bf16.mxu1 %v418_v0  ;;  %394 = vmatprep.mubr.msk.bf16.mxu1 %vm419_vm0, %v418_v0  ;;  %v403_v4 = vld [vmem:[%s533_s1 + $0x18] sm:$0xff]   ;;  %v404_v5 = vld [vmem:[%s533_s1 + $0x20] sm:$0xff]   ;;  %v405_v6 = vld [vmem:[%s533_s1 + $0x28] sm:$0xff]   ;;  %v139_v19 = vshrl.u32 %v138_v18, 7 }
   0x3   :  { %359 = vmatpush3.bf16.msra.mxu0 %v400_v1  ;;  %v406_v7 = vld [vmem:[%s533_s1 + $0x30] sm:$0xff]   ;;  %v407_v8 = vld [vmem:[%s533_s1 + $0x38] sm:$0xff]   ;;  %v27_v9 = vld [vmem:[%s534_s0] sm:$0x3] }
   0x4   :  { %360 = vmatprep.subr.bf16.mxu0 %v418_v0  ;;  %v408_v10 = vld [vmem:[%s535_s4] sm:$0xff]   ;;  %v409_v11 = vld [vmem:[%s535_s4 + $0x8] sm:$0xff]   ;;  %v410_v12 = vld [vmem:[%s535_s4 + $0x10] sm:$0xff]   ;;  %vm140_vm1 = vcmp.lt.s32.totalorder %v139_v19, 2 }
   0x5   :  { %379 = vmatpush3.bf16.msra.mxu1 %v408_v10  ;;  %v411_v13 = vld [vmem:[%s535_s4 + $0x18] sm:$0xff]   ;;  %v412_v14 = vld [vmem:[%s535_s4 + $0x20] sm:$0xff]   ;;  %v413_v15 = vld [vmem:[%s535_s4 + $0x28] sm:$0xff]   ;;  %v329_v26 = vsel %vm140_vm1, 1.0, %v418_v0 }
   0x6   :  { %380 = vmatprep.subr.bf16.mxu1 %v418_v0  ;;  %v414_v16 = vld [vmem:[%s535_s4 + $0x30] sm:$0xff]   ;;  %v415_v17 = vld [vmem:[%s535_s4 + $0x38] sm:$0xff]   ;;  %v143_v27 = vsub.f32 1.0, %v329_v26 }
   0x7   :  { %361 = vmatpush3.bf16.msra.mxu0 %v401_v2 }
   0x8   :  { %362 = vmatprep.subr.bf16.mxu0 %v418_v0  ;;  %v26_v20 = vld [vmem:[#allocation2] sm:$0xf] }
   0x9   :  { %381 = vmatpush3.bf16.msra.mxu1 %v409_v11 }
   0xa   :  { %382 = vmatprep.subr.bf16.mxu1 %v418_v0 }
   0xb   :  { %363 = vmatpush3.bf16.msra.mxu0 %v402_v3 }
   0xc   :  { %364 = vmatprep.subr.bf16.mxu0 %v418_v0 }
   0xd   :  { %383 = vmatpush3.bf16.msra.mxu1 %v410_v12 }
   0xe   :  { %384 = vmatprep.subr.bf16.mxu1 %v418_v0 }
   0xf   :  { %365 = vmatpush3.bf16.msra.mxu0 %v403_v4 }
  0x10   :  { %366 = vmatprep.subr.bf16.mxu0 %v418_v0 }
  0x11   :  { %385 = vmatpush3.bf16.msra.mxu1 %v411_v13  ;;  %v330_v13 = vld [vmem:[%s536_s2] ss:$0 sm:$0xff] }
  0x12   :  { %386 = vmatprep.subr.bf16.mxu1 %v418_v0 }
  0x13   :  { %367 = vmatpush3.bf16.msra.mxu0 %v404_v5 }
  0x14   :  { %368 = vmatprep.subr.bf16.mxu0 %v418_v0 }
  0x15   :  { %387 = vmatpush3.bf16.msra.mxu1 %v412_v14 }
  0x16   :  { %388 = vmatprep.subr.bf16.mxu1 %v418_v0 }
  0x17   :  { %369 = vmatpush3.bf16.msra.mxu0 %v405_v6 }
  0x18   :  { %370 = vmatprep.subr.bf16.mxu0 %v418_v0 }
  0x19   :  { %389 = vmatpush3.bf16.msra.mxu1 %v413_v15  ;;  %v331_v15 = vld [vmem:[%s537_s3] ss:$0 sm:$0xff] }
  0x1a   :  { %390 = vmatprep.subr.bf16.mxu1 %v418_v0 }
  0x1b   :  { %371 = vmatpush3.bf16.msra.mxu0 %v406_v7 }
  0x1c   :  { %372 = vmatprep.subr.bf16.mxu0 %v418_v0 }
  0x1d   :  { %391 = vmatpush3.bf16.msra.mxu1 %v414_v16 }
  0x1e   :  { %392 = vmatprep.subr.bf16.mxu1 %v418_v0 }
  0x1f   :  { %373 = vmatpush3.bf16.msra.mxu0 %v407_v8 }
  0x21   :  { %393 = vmatpush3.bf16.msra.mxu1 %v415_v17 }
  0x22   :  { %375 = vmatmul.mubr.bf16.vlgmr.msra.gmra.mrb[0].mxu0 %v27_v9 }
  0xf5   :  { %v126_v21 = vpop.f32.mrb[0].mxu0 }
  0xf6   :  { %v132_v22 = vadd.f32 %v126_v21, %v26_v20  ;;  %v376_v23 = vpop.f32.mrb[1].mxu0 }
  0xf7   :  { %v129_v24 = vpop.f32.mrb[2].mxu0 }
  0xf8   :  { %133 = vst [vmem:[#allocation2] sm:$0xf] %v132_v22  ;;  %v377_v25 = vpop.f32.mrb[3].mxu0 }
  0xff   :  { %v137_v28 = vld [vmem:[#allocation2] sm:$0xf] }
 0x100   :  { %v144_v29 = vmul.f32 %v329_v26, %v137_v28  ;;  %v154_v30 = vmul.f32 %v137_v28, %v137_v28  ;;  %v167_v31 = vmul.f32 %v143_v27, %v137_v28 }
 0x102   :  { %v146_v32 = vsel %vm145_vm2, %v144_v29, 0.0  ;;  %v155_v33 = vmul.f32 %v329_v26, %v154_v30  ;;  %v168_v34 = vsel %vm145_vm2, %v167_v31, 0.0  ;;  %v176_v35 = vmul.f32 %v154_v30, %v143_v27 }
 0x103   :  { %v147_v36 = vrot.slane %v146_v32, 4  ;;  %v169_v37 = vrot.slane %v168_v34, 4 }
 0x104   :  { %v156_v38 = vsel %vm145_vm2, %v155_v33, 0.0  ;;  %v177_v39 = vsel %vm145_vm2, %v176_v35, 0.0 }
 0x105   :  { %v148_v40 = vadd.f32 %v147_v36, %v146_v32  ;;  %v157_v41 = vrot.slane %v156_v38, 4  ;;  %v170_v42 = vadd.f32 %v169_v37, %v168_v34  ;;  %v178_v43 = vrot.slane %v177_v39, 4 }
 0x107   :  { %v149_v44 = vrot.slane %v148_v40, 2  ;;  %v158_v45 = vadd.f32 %v157_v41, %v156_v38  ;;  %v171_v46 = vrot.slane %v170_v42, 2  ;;  %v179_v47 = vadd.f32 %v178_v43, %v177_v39 }
 0x109   :  { %v150_v48 = vadd.f32 %v149_v44, %v148_v40  ;;  %v159_v49 = vrot.slane %v158_v45, 2  ;;  %v172_v50 = vadd.f32 %v171_v46, %v170_v42  ;;  %v180_v51 = vrot.slane %v179_v47, 2 }
 0x10b   :  { %v151_v52 = vrot.slane %v150_v48, 1  ;;  %v160_v53 = vadd.f32 %v159_v49, %v158_v45  ;;  %v173_v54 = vrot.slane %v172_v50, 1  ;;  %v181_v55 = vadd.f32 %v180_v51, %v179_v47 }
 0x10d   :  { %v152_v56 = vadd.f32 %v151_v52, %v150_v48  ;;  %v161_v57 = vrot.slane %v160_v53, 1  ;;  %v174_v58 = vadd.f32 %v173_v54, %v172_v50  ;;  %v182_v59 = vrot.slane %v181_v55, 1 }
 0x10f   :  { %v153_v60 = vmul.f32 0.5, %v152_v56  ;;  %v162_v61 = vadd.f32 %v161_v57, %v160_v53  ;;  %v175_v62 = vmul.f32 0.5, %v174_v58  ;;  %v183_v63 = vadd.f32 %v182_v59, %v181_v55 }
 0x111   :  { %v163_v0 = vmul.f32 0.5, %v162_v61  ;;  %v164_v1 = vmul.f32 %v153_v60, %v153_v60  ;;  %v184_v2 = vmul.f32 0.5, %v183_v63  ;;  %v185_v3 = vmul.f32 %v175_v62, %v175_v62 }
 0x112   :  { %v188_v10 = vsel %vm140_vm1, %v153_v60, %v175_v62 }
 0x113   :  { %v165_v4 = vsub.f32 %v163_v0, %v164_v1  ;;  %v186_v5 = vsub.f32 %v184_v2, %v185_v3  ;;  %v190_v11 = vsub.f32 %v137_v28, %v188_v10 }
 0x115   :  { %v166_v6 = vmax.f32 %v165_v4, 0.0  ;;  %v187_v7 = vmax.f32 %v186_v5, 0.0 }
 0x117   :  { %v189_v8 = vsel %vm140_vm1, %v166_v6, %v187_v7 }
 0x118   :  { %v191_v9 = vadd.f32 1e-05, %v189_v8 }
 0x11a   :  { %416 = vrsqrt.f32 %v191_v9 }
 0x124   :  { %v417_v12 = vpop.eup %416 }
 0x125   :  { %v193_v14 = vmul.f32 %v417_v12, %v190_v11 }
 0x127   :  { %v201_v16 = vmul.f32 %v330_v13, %v193_v14 }
 0x129   :  { %v209_v17 = vadd.f32 %v331_v15, %v201_v16 }
 0x12b   :  { %v210_v18 = vmax.f32 %v209_v17, 0.0 }
 0x12d   :  { %v211_v20 = vpack.c.bf16 %v210_v18, %v210_v18 }
 0x12f   :  { %395 = vmatmul.mubr.bf16.vlgmr.msra.gmra.mrb[0].mxu1 %v211_v20 }
 0x202   :  { %v310_v21 = vpop.f32.mrb[0].mxu1 }
 0x203   :  { %316 = vst [vmem:[%s538_s5] sm:$0xf] %v310_v21  ;;  %v396_v19 = vpop.f32.mrb[1].mxu1 }
 0x204   :  { %v313_v22 = vpop.f32.mrb[2].mxu1 }
 0x205   :  { %v397_v23 = vpop.f32.mrb[3].mxu1 }

// kernel: moco_forward.7
= control target key start
LH: loop header
LB: loop body
LE: loop exit
PB: predicated region body
PF: predicated region fallthrough
CT: control target
= control target key end

     0   :  { %vm20_vm0 = vcmask 1041408   ;;  %s374_s0 = inlined_call_operand.vmem [shape: f32[2,128], index: 0, kind: input, shape index: {}]   ;;  %s375_s1 = inlined_call_operand.vmem [shape: f32[2,128], index: 1, kind: input, shape index: {}]   ;;  %s376_s2 = inlined_call_operand.vmem [shape: f32[2,128], index: 2, kind: input, shape index: {}]   ;;  %s377_s3 = inlined_call_operand.vmem [shape: f32[2,128], index: 3, kind: input, shape index: {}]   ;;  %s378_s4 = inlined_call_operand.hbm [shape: f32[1,1], index: 4, kind: output, shape index: {}]  }
   0x1   :  { %v35_v0 = vld [vmem:[%s376_s2] sm:$0x3] }
   0x2   :  { %v18_v1 = vld [vmem:[%s374_s0] sm:$0x3]  ;;  %v36_v2 = vmul.f32 %v35_v0, %v35_v0 }
   0x3   :  { %v19_v3 = vmul.f32 %v18_v1, %v18_v1  ;;  %v43_v4 = vld [vmem:[%s377_s3] sm:$0x3] }
   0x4   :  { %v27_v5 = vld [vmem:[%s375_s1] sm:$0x3] }
   0x5   :  { %9 = vsyncpa [#allocation3], 0  ;;  %v44_v6 = vmul.f32 %v43_v4, %v43_v4  ;;  %v28_v7 = vmul.f32 %v27_v5, %v27_v5  ;;  %v37_v8 = vsel %vm20_vm0, %v36_v2, 0.0  ;;  %v21_v9 = vsel %vm20_vm0, %v19_v3, 0.0  ;;  %s300_s24 = scalar_lea.hbm %s378_s4, 16 }
   0x6   :  { %38 = vadd.xlane.f32.xlu0 %v37_v8  ;;  %22 = vadd.xlane.f32.xlu1 %v21_v9  ;;  %v312_v12 = vmov 0.0   ;;  %vm313_vm1 = vmmov 0   ;;  %vm125_vm2 = vcmask 9216   ;;  %vm139_vm3 = vcmask 1024   ;;  %p301_p0 = scmp.ne.s32.totalorder %s378_s4, %s300_s24  ;;  %p304_p1 = scmp.lt.u32.totalorder %s300_s24, %s378_s4 }
   0x7   :  { %v45_v10 = vsel %vm20_vm0, %v44_v6, 0.0  ;;  %v29_v11 = vsel %vm20_vm0, %v28_v7, 0.0  ;;  %272 = vmatprep.subr.mxu1 %v312_v12  ;;  %267 = vmatprep.subr.mxu0 %v312_v12 }
   0x8   :  { %274 = vmatprep.mubr.msk.f32.mxu1 %vm313_vm1, %v312_v12  ;;  %269 = vmatprep.mubr.msk.f32.mxu0 %vm313_vm1, %v312_v12  ;;  %p306_p2 = pnand %p304_p1, %p301_p0 }
   0xa   :  { %46 = vadd.xlane.f32.xlu0 %v45_v10  ;;  %30 = vadd.xlane.f32.xlu1 %v29_v11 }
  0x93   :  { %v39_v13 = vpop.xlane.xlu0 %38  ;;  %v23_v14 = vpop.xlane.xlu1 %22 }
  0x94   :  { %v40_v15 = vmax.f32 %v39_v13, 1e-24  ;;  %v24_v16 = vmax.f32 %v23_v14, 1e-24 }
  0x96   :  { %284 = vrsqrt.f32 %v40_v15 }
  0x97   :  { %286 = vrsqrt.f32 %v24_v16  ;;  %v47_v17 = vpop.xlane.xlu0 %46  ;;  %v31_v18 = vpop.xlane.xlu1 %30 }
  0x98   :  { %v48_v19 = vmax.f32 %v47_v17, 1e-24  ;;  %v32_v20 = vmax.f32 %v31_v18, 1e-24 }
  0x9a   :  { %288 = vrsqrt.f32 %v48_v19 }
  0x9b   :  { %290 = vrsqrt.f32 %v32_v20 }
  0xa0   :  { %v285_v21 = vpop.eup %284 }
  0xa1   :  { %v287_v22 = vpop.eup %286  ;;  %v42_v23 = vmul.f32 %v285_v21, %v35_v0 }
  0xa2   :  { %v26_v24 = vmul.f32 %v287_v22, %v18_v1 }
  0xa3   :  { %273 = vmatpush3.xpose.msra.mxu1 %v42_v23 }
  0xa4   :  { %v289_v25 = vpop.eup %288 }
  0xa5   :  { %v291_v26 = vpop.eup %290  ;;  %v50_v27 = vmul.f32 %v289_v25, %v43_v4 }
  0xa6   :  { %v34_v28 = vmul.f32 %v291_v26, %v27_v5 }
  0xa7   :  { %268 = vmatpush3.xpose.msra.mxu0 %v50_v27  ;;  %v121_v29 = vmul.f32 %v50_v27, %v26_v24 }
  0xa8   :  { %275 = vmatmul.mubr.f32.vlgmr.msra.gmra.mrb[0].mxu1 %v34_v28  ;;  %v220_v30 = vmul.f32 %v42_v23, %v34_v28 }
  0xa9   :  { %v122_v48 = vsel %vm20_vm0, %v121_v29, 0.0 }
  0xaa   :  { %270 = vmatmul.mubr.f32.vlgmr.msra.gmra.mrb[0].mxu0 %v26_v24  ;;  %v221_v47 = vsel %vm20_vm0, %v220_v30, 0.0 }
 0x17b   :  { %v216_v31 = vpop.f32.mrb[0].mxu1 }
 0x17c   :  { %v224_v32 = vsel %vm125_vm2, %v216_v31, -inf  ;;  %v276_v33 = vpop.f32.mrb[1].mxu1 }
 0x17d   :  { %225 = vmax.xlane.f32.xlu1 %v224_v32  ;;  %v117_v34 = vpop.f32.mrb[0].mxu0 }
 0x17e   :  { %v271_v35 = vpop.f32.mrb[1].mxu0  ;;  %v126_v36 = vsel %vm125_vm2, %v117_v34, -inf }
 0x17f   :  { %127 = vmax.xlane.f32.xlu0 %v126_v36 }
 0x20a   :  { %v226_v37 = vpop.xlane.xlu1 %225 }
 0x20b   :  { %v227_v38 = vsub.f32 %v216_v31, %v226_v37 }
 0x20c   :  { %v128_v39 = vpop.xlane.xlu0 %127 }
 0x20d   :  { %v228_v40 = vmul.f32 1.442695, %v227_v38  ;;  %v129_v41 = vsub.f32 %v117_v34, %v128_v39 }
 0x20f   :  { %292 = vpow2.f32 %v228_v40  ;;  %v130_v42 = vmul.f32 1.442695, %v129_v41 }
 0x211   :  { %294 = vpow2.f32 %v130_v42 }
 0x219   :  { %v293_v43 = vpop.eup %292 }
 0x21a   :  { %v230_v44 = vsel %vm125_vm2, %v293_v43, 0.0 }
 0x21b   :  { %v295_v45 = vpop.eup %294  ;;  %231 = vadd.xlane.f32.xlu1 %v230_v44 }
 0x21c   :  { %v132_v46 = vsel %vm125_vm2, %v295_v45, 0.0 }
 0x21d   :  { %133 = vadd.xlane.f32.xlu0 %v132_v46 }
 0x21f   :  { %222 = vadd.xlane.f32.xlu1 %v221_v47 }
 0x221   :  { %123 = vadd.xlane.f32.xlu0 %v122_v48 }
 0x2a8   :  { %v232_v49 = vpop.xlane.xlu1 %231 }
 0x2a9   :  { %296 = vlog2.f32 %v232_v49 }
 0x2aa   :  { %v134_v50 = vpop.xlane.xlu0 %133 }
 0x2ab   :  { %298 = vlog2.f32 %v134_v50 }
 0x2ac   :  { %v223_v56 = vpop.xlane.xlu1 %222 }
 0x2ae   :  { %v124_v59 = vpop.xlane.xlu0 %123 }
 0x2b3   :  { %v297_v51 = vpop.eup %296 }
 0x2b4   :  { %v234_v52 = vmul.f32 0.6931472, %v297_v51 }
 0x2b5   :  { %v299_v53 = vpop.eup %298 }
 0x2b6   :  { %v136_v54 = vmul.f32 0.6931472, %v299_v53  ;;  %v235_v55 = vadd.f32 %v234_v52, %v226_v37 }
 0x2b8   :  { %v236_v57 = vsub.f32 %v235_v55, %v223_v56  ;;  %v137_v58 = vadd.f32 %v136_v54, %v128_v39 }
 0x2ba   :  { %v138_v60 = vsub.f32 %v137_v58, %v124_v59  ;;  %v237_v61 = vsel %vm139_vm3, %v236_v57, 0.0 }
 0x2bb   :  { %238 = vadd.xlane.f32.xlu1 %v237_v61 }
 0x2bc   :  { %v140_v62 = vsel %vm139_vm3, %v138_v60, 0.0 }
 0x2bd   :  { %141 = vadd.xlane.f32.xlu0 %v140_v62 }
 0x348   :  { %v239_v63 = vpop.xlane.xlu1 %238 }
 0x349   :  { %v240_v0 = vrot.slane %v239_v63, 4 }
 0x34a   :  { %v142_v1 = vpop.xlane.xlu0 %141 }
 0x34b   :  { %v241_v2 = vadd.f32 %v240_v0, %v239_v63  ;;  %v143_v3 = vrot.slane %v142_v1, 4 }
 0x34d   :  { %v242_v4 = vrot.slane %v241_v2, 2  ;;  %v144_v5 = vadd.f32 %v143_v3, %v142_v1 }
 0x34f   :  { %v243_v6 = vadd.f32 %v242_v4, %v241_v2  ;;  %v145_v7 = vrot.slane %v144_v5, 2 }
 0x351   :  { %v146_v8 = vadd.f32 %v145_v7, %v144_v5  ;;  %v244_v9 = vrot.slane %v243_v6, 1 }
 0x353   :  { %v147_v10 = vrot.slane %v146_v8, 1  ;;  %v245_v12 = vadd.f32 %v244_v9, %v243_v6 }
 0x355   :  { %v148_v11 = vadd.f32 %v147_v10, %v146_v8 }
 0x357   :  { %277 = vpush %v148_v11 }
 0x358   :  { %279 = vpush %v245_v12 }
 0x388   :  { %s278_s0 = spop %277 }
 0x389   :  { %s280_s1 = spop %279 }
 0x38a   :  { %s247_s2 = sadd.f32 %s280_s1, %s278_s0 }
 0x38c   :  { %249 = sst [smem:[#allocation2]] %s247_s2 }
 0x38d   :  { %309 = shalt.err (!%p306_p2)
}
 0x38e   :  { %s314_s29 = smov [#allocation2]  }
 0x38f   :  { %257 = dma.smem_to_hbm %s314_s29, 16, %s378_s4, [#allocation3]  }
 0x390   :  { %310 = dma.done.wait [#allocation3], 16  }
 0x391   :  { %311 = vsyncadd [#allocation3], 4294967280 }
 0x392   :  { %261 = sfence }
 0x393   :  { %262 = vsyncpa [#allocation3], 1 }

// kernel: moco_forward.5
= control target key start
LH: loop header
LB: loop body
LE: loop exit
PB: predicated region body
PF: predicated region fallthrough
CT: control target
= control target key end

     0   :  { %s1102_s18 = smov 0   ;;  %s1247_s0 = inlined_call_operand.vmem [shape: bf16[4,1024], index: 0, kind: input, shape index: {}]   ;;  %s1248_s1 = inlined_call_operand.vmem [shape: bf16[1024,128], index: 1, kind: input, shape index: {}]   ;;  %s1249_s2 = inlined_call_operand.vmem [shape: f32[1,128], index: 2, kind: input, shape index: {}]   ;;  %s1250_s3 = inlined_call_operand.vmem [shape: f32[1,128], index: 3, kind: input, shape index: {}]   ;;  %s1251_s4 = inlined_call_operand.vmem [shape: bf16[128,128], index: 4, kind: input, shape index: {}]   ;;  %s1252_s5 = inlined_call_operand.vmem [shape: f32[4,128], index: 5, kind: output, shape index: {}]  }
   0x1 LB: > { %s1108_s19 = sadd.s32 4294967295, %s1066_s18   ;;  %p878_p0 = scmp.ge.s32.totalorder %s1066_s18, 1  ;;  %s1066_s18 = sphi %s1102_s18, %s15_s18  }
   0x2   : > { %p194_p1 = scmp.lt.s32.totalorder %s1066_s18, 3 }
   0x4   : > { %p195_p2 = pnand %p878_p0, %p194_p1 }
   0x5   : > { %s879_s20 = sshll.u32 (!%p195_p2), %s1108_s19, 2  ;;  %s881_s21 = sshll.u32 (!%p195_p2), %s1108_s19, 6 }
   0x6   : > { %198 = sbr.rel (%p195_p2) target bundleno = 584 (0x248), region = 40  ;;  %p223_p3 = scmp.lt.s32.totalorder (!%p195_p2), %s879_s20, 7 }
   0x7   : > { %p229_p4 = scmp.lt.s32.totalorder (!%p195_p2), %s881_s21, 127  ;;  %p883_p5 = scmp.ne.s32.totalorder (!%p195_p2), %s1108_s19, 0 }
   0xd   : > { %s1254_s20 = smov (!%p223_p3, %s879_s20), 7  ;;  %s1256_s21 = smov (!%p229_p4, %s881_s21), 127 }
   0xe   : > { %s880_s22 = sshll.u32 %s1254_s20, 1  ;;  %s882_s26 = sshll.u32 %s1256_s21, 2  ;;  %v1068_v0 = vmov (!%p883_p5), 0.0  }
   0xf   : > { %s1117_s25 = scalar_lea.vmem %s1247_s0, %s880_s22  ;;  %s1122_s29 = scalar_lea.vmem %s1248_s1, %s882_s26  ;;  %239 = vst [vmem:[#allocation2] sm:$0xf] (!%p883_p5), %v1068_v0 }
  0x10   : > { %238 = sbr.rel (%p883_p5) target bundleno = 23 (0x17), region = 44 }
  0x17 PF: > { %v1015_v1 = vld [vmem:[%s1122_s29 + $0x40] sm:$0xff]   ;;  %v1019_v5 = vld [vmem:[%s1122_s29 + $0x48] sm:$0xff]   ;;  %v1023_v9 = vld [vmem:[%s1122_s29 + $0x50] sm:$0xff]   ;;  %v311_v31 = vlaneseq  ;;  %v1069_v35 = vmov 1983009808   ;;  %p916_p6 = scmp.ne.s32.totalorder %s1108_s19, 1 }
  0x18   : > { %v1016_v2 = vld [vmem:[%s1122_s29 + $0xc0] sm:$0xff]   ;;  %930 = vmatprep.subr.bf16.mxu0 %v1015_v1  ;;  %v1020_v6 = vld [vmem:[%s1122_s29 + $0xc8] sm:$0xff]   ;;  %v1024_v10 = vld [vmem:[%s1122_s29 + $0xd0] sm:$0xff]   ;;  %v309_v36 = vunpack.c.l.s4 %v1069_v35  ;;  %v1070_v59 = vmov (!%p916_p6), 0.0   ;;  %vm1071_vm0 = vmmov (!%p916_p6), 0   ;;  %vm614_vm2 = vcmask (!%p916_p6), 1043456  }
  0x19   : > { %v1017_v3 = vld [vmem:[%s1122_s29] sm:$0xff]   ;;  %952 = vmatprep.subr.bf16.mxu1 %v1016_v2  ;;  %v1021_v7 = vld [vmem:[%s1122_s29 + $0x8] sm:$0xff]   ;;  %v1025_v11 = vld [vmem:[%s1122_s29 + $0x10] sm:$0xff]   ;;  %v1158_v37 = vshrl.u32 %v311_v31, 7 }
  0x1a   : > { %v1018_v4 = vld [vmem:[%s1122_s29 + $0x80] sm:$0xff]   ;;  %931 = vmatpush3.bf16.msra.mxu0 %v1017_v3  ;;  %v1022_v8 = vld [vmem:[%s1122_s29 + $0x88] sm:$0xff]   ;;  %v1026_v12 = vld [vmem:[%s1122_s29 + $0x90] sm:$0xff]   ;;  %v310_v38 = vunpack.c.0.s8 %v309_v36 }
  0x1b   : > { %953 = vmatpush3.bf16.msra.mxu1 %v1018_v4  ;;  %932 = vmatprep.subr.bf16.mxu0 %v1019_v5  ;;  %v1027_v13 = vld [vmem:[%s1122_s29 + $0x58] sm:$0xff]   ;;  %v1031_v17 = vld [vmem:[%s1122_s29 + $0x60] sm:$0xff]   ;;  %v1035_v21 = vld [vmem:[%s1122_s29 + $0x68] sm:$0xff]   ;;  %vm609_vm1 = vcmp.lt.s32.totalorder (!%p916_p6), %v1158_v37, 2 }
  0x1c   : > { %954 = vmatprep.subr.bf16.mxu1 %v1020_v6  ;;  %v1028_v14 = vld [vmem:[%s1122_s29 + $0xd8] sm:$0xff]   ;;  %v1032_v18 = vld [vmem:[%s1122_s29 + $0xe0] sm:$0xff]   ;;  %v1036_v22 = vld [vmem:[%s1122_s29 + $0xe8] sm:$0xff]   ;;  %v313_v40 = vsub.s32 %v310_v38, %v1158_v37  ;;  %v1175_v61 = vsel (!%p916_p6), %vm609_vm1, 1.0, %v1070_v59 }
  0x1d   : > { %v1029_v15 = vld [vmem:[%s1122_s29 + $0x18] sm:$0xff]   ;;  %v1033_v19 = vld [vmem:[%s1122_s29 + $0x20] sm:$0xff]   ;;  %v1037_v23 = vld [vmem:[%s1122_s29 + $0x28] sm:$0xff]   ;;  %v1178_v62 = vsub.f32 (!%p916_p6), 1.0, %v1175_v61 }
  0x1e   : > { %933 = vmatpush3.bf16.msra.mxu0 %v1021_v7  ;;  %v1030_v16 = vld [vmem:[%s1122_s29 + $0x98] sm:$0xff]   ;;  %v1034_v20 = vld [vmem:[%s1122_s29 + $0xa0] sm:$0xff]   ;;  %v1038_v24 = vld [vmem:[%s1122_s29 + $0xa8] sm:$0xff]  }
  0x1f   : > { %955 = vmatpush3.bf16.msra.mxu1 %v1022_v8  ;;  %934 = vmatprep.subr.bf16.mxu0 %v1023_v9  ;;  %v1039_v25 = vld [vmem:[%s1122_s29 + $0x70] sm:$0xff]   ;;  %v1043_v29 = vld [vmem:[%s1122_s29 + $0x78] sm:$0xff]   ;;  %v241_v34 = vld [vmem:[%s1117_s25] sm:$0xff] }
  0x20   : > { %956 = vmatprep.subr.bf16.mxu1 %v1024_v10  ;;  %v1040_v26 = vld [vmem:[%s1122_s29 + $0xf0] sm:$0xff]   ;;  %v1044_v30 = vld [vmem:[%s1122_s29 + $0xf8] sm:$0xff]   ;;  %v307_v39 = vcombine.high %v241_v34, %v241_v34  ;;  %v314_v41 = vrot.slane %v241_v34, %v313_v40  ;;  %v240_v53 = vld [vmem:[#allocation2] sm:$0xf] }
  0x21   : > { %v1041_v27 = vld [vmem:[%s1122_s29 + $0x30] sm:$0xff]   ;;  %v1045_v32 = vld [vmem:[%s1122_s29 + $0x38] sm:$0xff]   ;;  %v1048_v58 = vld [vmem:[%s1251_s4] sm:$0xff] (!%p916_p6)  }
  0x22   : > { %935 = vmatpush3.bf16.msra.mxu0 %v1025_v11  ;;  %v1042_v28 = vld [vmem:[%s1122_s29 + $0xb0] sm:$0xff]   ;;  %v1046_v33 = vld [vmem:[%s1122_s29 + $0xb8] sm:$0xff]   ;;  %v321_v42 = vrot.slane %v307_v39, %v313_v40  ;;  %v322_v43 = vcombine.high %v314_v41, %v314_v41  ;;  %v1049_v60 = vld [vmem:[%s1251_s4 + $0x8] sm:$0xff] (!%p916_p6)  }
  0x23   : > { %957 = vmatpush3.bf16.msra.mxu1 %v1026_v12  ;;  %936 = vmatprep.subr.bf16.mxu0 %v1027_v13  ;;  %v1050_v63 = vld [vmem:[%s1251_s4 + $0x10] sm:$0xff] (!%p916_p6)   ;;  %v1051_v4 = vld [vmem:[%s1251_s4 + $0x18] sm:$0xff] (!%p916_p6)   ;;  %v1052_v13 = vld [vmem:[%s1251_s4 + $0x20] sm:$0xff] (!%p916_p6)  }
  0x24   : > { %958 = vmatprep.subr.bf16.mxu1 %v1028_v14  ;;  %v323_v44 = vcombine.high %v321_v42, %v321_v42  ;;  %552 = vmatprep.mubr.bf16.mxu0 %v322_v43  ;;  %v1054_v31 = vld [vmem:[%s1251_s4 + $0x30] sm:$0xff] (!%p916_p6)  }
  0x26   : > { %937 = vmatpush3.bf16.msra.mxu0 %v1029_v15  ;;  %592 = vmatprep.mubr.bf16.mxu1 %v323_v44 }
  0x27   : > { %959 = vmatpush3.bf16.msra.mxu1 %v1030_v16  ;;  %938 = vmatprep.subr.bf16.mxu0 %v1031_v17 }
  0x28   : > { %960 = vmatprep.subr.bf16.mxu1 %v1032_v18 }
  0x2a   : > { %939 = vmatpush3.bf16.msra.mxu0 %v1033_v19 }
  0x2b   : > { %961 = vmatpush3.bf16.msra.mxu1 %v1034_v20  ;;  %940 = vmatprep.subr.bf16.mxu0 %v1035_v21 }
  0x2c   : > { %962 = vmatprep.subr.bf16.mxu1 %v1036_v22  ;;  %v1053_v22 = vld [vmem:[%s1251_s4 + $0x28] sm:$0xff] (!%p916_p6)  }
  0x2e   : > { %941 = vmatpush3.bf16.msra.mxu0 %v1037_v23 }
  0x2f   : > { %963 = vmatpush3.bf16.msra.mxu1 %v1038_v24  ;;  %942 = vmatprep.subr.bf16.mxu0 %v1039_v25 }
  0x30   : > { %964 = vmatprep.subr.bf16.mxu1 %v1040_v26 }
  0x32   : > { %943 = vmatpush3.bf16.msra.mxu0 %v1041_v27 }
  0x33   : > { %965 = vmatpush3.bf16.msra.mxu1 %v1042_v28  ;;  %944 = vmatprep.subr.bf16.mxu0 %v1043_v29 }
  0x34   : > { %966 = vmatprep.subr.bf16.mxu1 %v1044_v30 }
  0x36   : > { %945 = vmatpush3.bf16.msra.mxu0 %v1045_v32 }
  0x37   : > { %967 = vmatpush3.bf16.msra.mxu1 %v1046_v33  ;;  %983 = vmatprep.subr.bf16.mxu0 (!%p916_p6), %v1070_v59 }
  0x39   : > { %553 = vmatmul.mubr.bf16.vlgmr.msra.gmra.mrb[0].mxu0 %v314_v41  ;;  %v1055_v41 = vld [vmem:[%s1251_s4 + $0x38] sm:$0xff] (!%p916_p6)  }
  0x3a   : > { %593 = vmatmul.mubr.bf16.vlgmr.msra.gmra.mrb[0].mxu1 %v321_v42  ;;  %984 = vmatpush3.bf16.msra.mxu0 (!%p916_p6), %v1048_v58 }
  0x3b   : > { %999 = vmatprep.mubr.msk.bf16.mxu0 (!%p916_p6), %vm1071_vm0, %v1070_v59  ;;  %985 = vmatprep.subr.bf16.mxu0 (!%p916_p6), %v1070_v59 }
  0x3e   : > { %986 = vmatpush3.bf16.msra.mxu0 (!%p916_p6), %v1049_v60 }
  0x3f   : > { %987 = vmatprep.subr.bf16.mxu0 (!%p916_p6), %v1070_v59 }
  0x42   : > { %988 = vmatpush3.bf16.msra.mxu0 (!%p916_p6), %v1050_v63 }
  0x43   : > { %989 = vmatprep.subr.bf16.mxu0 (!%p916_p6), %v1070_v59 }
  0x46   : > { %990 = vmatpush3.bf16.msra.mxu0 (!%p916_p6), %v1051_v4 }
  0x47   : > { %991 = vmatprep.subr.bf16.mxu0 (!%p916_p6), %v1070_v59 }
  0x4a   : > { %992 = vmatpush3.bf16.msra.mxu0 (!%p916_p6), %v1052_v13 }
  0x4b   : > { %993 = vmatprep.subr.bf16.mxu0 (!%p916_p6), %v1070_v59 }
  0x4e   : > { %994 = vmatpush3.bf16.msra.mxu0 (!%p916_p6), %v1053_v22 }
  0x4f   : > { %995 = vmatprep.subr.bf16.mxu0 (!%p916_p6), %v1070_v59 }
  0x52   : > { %996 = vmatpush3.bf16.msra.mxu0 (!%p916_p6), %v1054_v31 }
  0x53   : > { %997 = vmatprep.subr.bf16.mxu0 (!%p916_p6), %v1070_v59 }
  0x56   : > { %998 = vmatpush3.bf16.msra.mxu0 (!%p916_p6), %v1055_v41 }
 0x10c   : > { %v946_v45 = vpop.f32.mrb[0].mxu0 }
 0x10d   : > { %v968_v46 = vpop.f32.mrb[0].mxu1  ;;  %v947_v47 = vpop.f32.mrb[1].mxu0 }
 0x10e   : > { %v969_v48 = vpop.f32.mrb[1].mxu1  ;;  %v948_v49 = vadd.f32 %v947_v47, %v946_v45  ;;  %v949_v51 = vpop.f32.mrb[2].mxu0 }
 0x10f   : > { %v970_v50 = vadd.f32 %v969_v48, %v968_v46  ;;  %v971_v52 = vpop.f32.mrb[2].mxu1  ;;  %v950_v54 = vpop.f32.mrb[3].mxu0  ;;  %605 = sbr.rel (%p916_p6) target bundleno = 584 (0x248), region = 48 }
 0x110   : > { %v972_v55 = vpop.f32.mrb[3].mxu1 }
 0x111   : > { %v595_v56 = vadd.f32 %v970_v50, %v948_v49  ;;  %v918_v55 = vld [vmem:[%s1249_s2] ss:$0 sm:$0xff] (!%p916_p6) }
 0x113   : > { %v600_v57 = vadd.f32 %v595_v56, %v240_v53 }
 0x115   : > { %601 = vst [vmem:[#allocation2] sm:$0xf] %v600_v57  ;;  %v919_v57 = vld [vmem:[%s1250_s3] ss:$0 sm:$0xff] (!%p916_p6) }
 0x11c   : > { %v1184_v0 = vld [vmem:[#allocation2] sm:$0xf] }
 0x11d   : > { %v613_v1 = vmul.f32 %v1175_v61, %v1184_v0  ;;  %v623_v2 = vmul.f32 %v1184_v0, %v1184_v0  ;;  %v636_v3 = vmul.f32 %v1178_v62, %v1184_v0 }
 0x11f   : > { %v615_v5 = vsel %vm614_vm2, %v613_v1, 0.0  ;;  %v624_v6 = vmul.f32 %v1175_v61, %v623_v2  ;;  %v637_v7 = vsel %vm614_vm2, %v636_v3, 0.0  ;;  %v645_v8 = vmul.f32 %v623_v2, %v1178_v62 }
 0x120   : > { %v616_v9 = vrot.slane %v615_v5, 4  ;;  %v638_v10 = vrot.slane %v637_v7, 4 }
 0x121   : > { %v625_v11 = vsel %vm614_vm2, %v624_v6, 0.0  ;;  %v646_v12 = vsel %vm614_vm2, %v645_v8, 0.0 }
 0x122   : > { %v617_v14 = vadd.f32 %v616_v9, %v615_v5  ;;  %v626_v15 = vrot.slane %v625_v11, 4  ;;  %v639_v16 = vadd.f32 %v638_v10, %v637_v7  ;;  %v647_v17 = vrot.slane %v646_v12, 4 }
 0x124   : > { %v618_v18 = vrot.slane %v617_v14, 2  ;;  %v627_v19 = vadd.f32 %v626_v15, %v625_v11  ;;  %v640_v20 = vrot.slane %v639_v16, 2  ;;  %v648_v21 = vadd.f32 %v647_v17, %v646_v12 }
 0x126   : > { %v619_v23 = vadd.f32 %v618_v18, %v617_v14  ;;  %v628_v24 = vrot.slane %v627_v19, 2  ;;  %v641_v25 = vadd.f32 %v640_v20, %v639_v16  ;;  %v649_v26 = vrot.slane %v648_v21, 2 }
 0x128   : > { %v620_v27 = vrot.slane %v619_v23, 1  ;;  %v629_v28 = vadd.f32 %v628_v24, %v627_v19  ;;  %v642_v29 = vrot.slane %v641_v25, 1  ;;  %v650_v30 = vadd.f32 %v649_v26, %v648_v21 }
 0x12a   : > { %v621_v32 = vadd.f32 %v620_v27, %v619_v23  ;;  %v630_v33 = vrot.slane %v629_v28, 1  ;;  %v643_v34 = vadd.f32 %v642_v29, %v641_v25  ;;  %v651_v35 = vrot.slane %v650_v30, 1 }
 0x12c   : > { %v622_v36 = vmul.f32 0.5, %v621_v32  ;;  %v631_v38 = vadd.f32 %v630_v33, %v629_v28  ;;  %v644_v39 = vmul.f32 0.5, %v643_v34  ;;  %v652_v40 = vadd.f32 %v651_v35, %v650_v30 }
 0x12e   : > { %v632_v42 = vmul.f32 0.5, %v631_v38  ;;  %v633_v43 = vmul.f32 %v622_v36, %v622_v36  ;;  %v653_v44 = vmul.f32 0.5, %v652_v40  ;;  %v654_v45 = vmul.f32 %v644_v39, %v644_v39 }
 0x12f   : > { %v657_v52 = vsel %vm609_vm1, %v622_v36, %v644_v39 }
 0x130   : > { %v634_v46 = vsub.f32 %v632_v42, %v633_v43  ;;  %v655_v47 = vsub.f32 %v653_v44, %v654_v45  ;;  %v659_v53 = vsub.f32 %v1184_v0, %v657_v52 }
 0x132   : > { %v635_v48 = vmax.f32 %v634_v46, 0.0  ;;  %v656_v49 = vmax.f32 %v655_v47, 0.0 }
 0x134   : > { %v658_v50 = vsel %vm609_vm1, %v635_v48, %v656_v49 }
 0x135   : > { %v660_v51 = vadd.f32 1e-05, %v658_v50 }
 0x137   : > { %1056 = vrsqrt.f32 %v660_v51 }
 0x141   : > { %v1057_v54 = vpop.eup %1056 }
 0x142   : > { %v662_v56 = vmul.f32 %v1057_v54, %v659_v53 }
 0x144   : > { %v670_v58 = vmul.f32 %v918_v55, %v662_v56 }
 0x146   : > { %v678_v59 = vadd.f32 %v919_v57, %v670_v58 }
 0x148   : > { %v679_v60 = vmax.f32 %v678_v59, 0.0 }
 0x14a   : > { %v680_v63 = vpack.c.bf16 %v679_v60, %v679_v60 }
 0x14c   : > { %1000 = vmatmul.mubr.bf16.vlgmr.msra.gmra.mrb[0].mxu0 %v680_v63 }
 0x21f   : > { %v779_v1 = vpop.f32.mrb[0].mxu0 }
 0x220   : > { %v785_v2 = vmul.f32 %v1175_v61, %v779_v1  ;;  %v794_v3 = vmul.f32 %v779_v1, %v779_v1  ;;  %v807_v0 = vmul.f32 %v779_v1, %v1178_v62  ;;  %v1001_v4 = vpop.f32.mrb[1].mxu0 }
 0x221   : > { %v782_v5 = vpop.f32.mrb[2].mxu0 }
 0x222   : > { %v786_v6 = vsel %vm614_vm2, %v785_v2, 0.0  ;;  %v795_v7 = vmul.f32 %v1175_v61, %v794_v3  ;;  %v808_v8 = vsel %vm614_vm2, %v807_v0, 0.0  ;;  %v816_v9 = vmul.f32 %v794_v3, %v1178_v62  ;;  %v1002_v10 = vpop.f32.mrb[3].mxu0 }
 0x223   : > { %v787_v11 = vrot.slane %v786_v6, 4  ;;  %v809_v12 = vrot.slane %v808_v8, 4 }
 0x224   : > { %v796_v13 = vsel %vm614_vm2, %v795_v7, 0.0  ;;  %v817_v14 = vsel %vm614_vm2, %v816_v9, 0.0 }
 0x225   : > { %v788_v15 = vadd.f32 %v787_v11, %v786_v6  ;;  %v797_v16 = vrot.slane %v796_v13, 4  ;;  %v810_v17 = vadd.f32 %v809_v12, %v808_v8  ;;  %v818_v18 = vrot.slane %v817_v14, 4 }
 0x227   : > { %v789_v19 = vrot.slane %v788_v15, 2  ;;  %v798_v20 = vadd.f32 %v797_v16, %v796_v13  ;;  %v811_v21 = vrot.slane %v810_v17, 2  ;;  %v819_v22 = vadd.f32 %v818_v18, %v817_v14 }
 0x229   : > { %v790_v61 = vadd.f32 %v789_v19, %v788_v15  ;;  %v799_v23 = vrot.slane %v798_v20, 2  ;;  %v812_v24 = vadd.f32 %v811_v21, %v810_v17  ;;  %v820_v25 = vrot.slane %v819_v22, 2 }
 0x22b   : > { %v791_v62 = vrot.slane %v790_v61, 1  ;;  %v800_v26 = vadd.f32 %v799_v23, %v798_v20  ;;  %v813_v27 = vrot.slane %v812_v24, 1  ;;  %v821_v28 = vadd.f32 %v820_v25, %v819_v22 }
 0x22d   : > { %v792_v29 = vadd.f32 %v791_v62, %v790_v61  ;;  %v801_v30 = vrot.slane %v800_v26, 1  ;;  %v814_v31 = vadd.f32 %v813_v27, %v812_v24  ;;  %v822_v32 = vrot.slane %v821_v28, 1 }
 0x22f   : > { %v793_v33 = vmul.f32 0.5, %v792_v29  ;;  %v802_v34 = vadd.f32 %v801_v30, %v800_v26  ;;  %v815_v35 = vmul.f32 0.5, %v814_v31  ;;  %v823_v36 = vadd.f32 %v822_v32, %v821_v28 }
 0x231   : > { %v803_v38 = vmul.f32 0.5, %v802_v34  ;;  %v804_v39 = vmul.f32 %v793_v33, %v793_v33  ;;  %v824_v40 = vmul.f32 0.5, %v823_v36  ;;  %v825_v41 = vmul.f32 %v815_v35, %v815_v35 }
 0x232   : > { %v828_v48 = vsel %vm609_vm1, %v793_v33, %v815_v35 }
 0x233   : > { %v805_v42 = vsub.f32 %v803_v38, %v804_v39  ;;  %v826_v43 = vsub.f32 %v824_v40, %v825_v41  ;;  %v830_v49 = vsub.f32 %v779_v1, %v828_v48 }
 0x235   : > { %v806_v44 = vmax.f32 %v805_v42, 0.0  ;;  %v827_v45 = vmax.f32 %v826_v43, 0.0 }
 0x237   : > { %v829_v46 = vsel %vm609_vm1, %v806_v44, %v827_v45 }
 0x238   : > { %v831_v47 = vadd.f32 1e-05, %v829_v46 }
 0x23a   : > { %1058 = vrsqrt.f32 %v831_v47 }
 0x244   : > { %v1059_v50 = vpop.eup %1058 }
 0x245   : > { %v833_v51 = vmul.f32 %v1059_v50, %v830_v49 }
 0x247   : > { %834 = vst [vmem:[%s1252_s5] sm:$0xf] %v833_v51 }
 0x248 PF: > { %s15_s18 = sadd.s32 1, %s1066_s18  }
 0x249   : > { %p12_p7 = scmp.ge.s32.totalorder %s15_s18, 4  }
 0x24b   :  { %14 = sbr.rel (!%p12_p7) target bundleno = 1 (0x1), region = 77 }

</bundles_post_ra>
